<compile_context>
chip_gen: v5e
topology: v5e:2x2
jax: 0.10.0
libtpu: 0.0.40
codegen_flags: <defaults>
</compile_context>

<pallas_src>
import collections

import jax
import jax.numpy as jnp
from jax.experimental import pallas as pl
from jax.experimental.pallas import tpu as pltpu

MultiGraph = collections.namedtuple('Graph', ['node_features', 'edge_sets'])
EdgeSet = collections.namedtuple('EdgeSet', ['name', 'features', 'senders', 'receivers'])

LATENT_SIZE = 32
ROW_BLOCK = 1024         # original rows per grid step
LN_EPS = 1e-5            # torch.nn.LayerNorm default eps
_LANES = 128


def _fused_mlp_ln_kernel(gid_ref, x_ref, w1_ref, w2_ref, p_ref, seg_ref, o_ref):
    """Packed MLP (Linear-ReLU-Linear) + per-segment LayerNorm for one row tile.

    One grid step handles ROW_BLOCK original rows, packed PACK-per-lane-row:
      x_ref   : (TB, PACK*FEAT_PAD)      bf16  packed input rows
      w1_ref  : (1, PACK*FEAT_PAD, 128)  bf16  block-diag replicated W1
      w2_ref  : (1, 128, 128)            bf16  block-diag replicated W2
      p_ref   : (1, 4, 128)              f32   rows = [b1, b2, gamma, beta] (lane-tiled)
      seg_ref : (128, 128)               f32   block-diag(ones/latent) -> segment means
      o_ref   : (TB, 128)                f32   packed LayerNorm output
    """
    del gid_ref  # only consumed by the index_maps
    x = x_ref[...]
    p = p_ref[0]                                   # (4, 128) f32
    b1, b2 = p[0:1, :], p[1:2, :]
    gamma, beta = p[2:3, :], p[3:4, :]

    h = jnp.dot(x, w1_ref[0], preferred_element_type=jnp.float32) + b1
    h = jnp.maximum(h, 0.0)                        # f32 VPU
    y = jnp.dot(h.astype(jnp.bfloat16), w2_ref[0],
                preferred_element_type=jnp.float32) + b2

    # Per-32-lane-segment LayerNorm via block-diagonal averaging matmuls
    # (keeps everything lane-dense; no cross-lane reshape needed).
    seg = seg_ref[...]
    mean = jnp.dot(y, seg, preferred_element_type=jnp.float32)
    meansq = jnp.dot(y * y, seg, preferred_element_type=jnp.float32)
    var = jnp.maximum(meansq - mean * mean, 0.0)
    yn = (y - mean) * jax.lax.rsqrt(var + LN_EPS)
    o_ref[...] = (yn * gamma + beta).astype(o_ref.dtype)


def encode_all(feature_list, params_list, latent, *, row_block=ROW_BLOCK):
    """Run MLP+LayerNorm for every feature group in ONE pallas_call.

    feature_list[g] : (N_g, F_g) float array
    params_list[g]  : (w1, b1, w2, b2, gamma, beta), w1 of shape (F_g, latent)
    Returns a list of (N_g, latent) float32 arrays.
    """
    assert _LANES % latent == 0, "latent size must divide 128"
    pack = _LANES // latent                    # original rows packed per lane row
    assert row_block % (16 * pack) == 0, "row_block must keep packed tile 16-aligned"
    tb = row_block // pack                     # packed sublane rows per tile
    lanes_out = pack * latent                  # == 128

    max_in = max(f.shape[-1] for f in feature_list)
    feat_pad = -(-max_in // latent) * latent   # multiple of latent -> pack*feat_pad % 128 == 0
    lanes_in = pack * feat_pad

    # ---- pack all groups into one lane-dense row slab (rows padded per group
    #      so no tile straddles a group boundary) -----------------------------
    num_rows, tiles_per_group, padded = [], [], []
    for f in feature_list:
        n, fin = f.shape
        tiles = max(1, -(-n // row_block))
        r_pad = tiles * row_block
        num_rows.append(n)
        tiles_per_group.append(tiles)
        padded.append(jnp.pad(f.astype(jnp.float32),
                              ((0, r_pad - n), (0, feat_pad - fin))))
    x_all = jnp.concatenate(padded, axis=0)                      # (R_total, feat_pad)
    r_total = x_all.shape[0]
    x_packed = x_all.reshape(r_total // pack, lanes_in).astype(jnp.bfloat16)

    # scalar-prefetched tile -> group-id table
    gid_host = []
    for g, t in enumerate(tiles_per_group):
        gid_host.extend([g] * t)
    gid = jnp.asarray(gid_host, dtype=jnp.int32)
    num_tiles = len(gid_host)

    # ---- per-group parameters, replicated block-diagonally so packed rows see
    #      exactly the original per-row MLP -----------------------------------
    eye = jnp.eye(pack, dtype=jnp.float32)
    w1p, w2p, pslab = [], [], []
    for (w1, b1, w2, b2, gamma, beta), f in zip(params_list, feature_list):
        fin = f.shape[-1]
        w1_pad = jnp.zeros((feat_pad, latent), jnp.float32).at[:fin, :].set(w1)
        w1p.append(jnp.kron(eye, w1_pad))             # (lanes_in, lanes_out)
        w2p.append(jnp.kron(eye, w2))                 # (lanes_out, lanes_out)
        pslab.append(jnp.concatenate([jnp.tile(b1, (1, pack)),
                                      jnp.tile(b2, (1, pack)),
                                      jnp.tile(gamma, (1, pack)),
                                      jnp.tile(beta, (1, pack))], axis=0))  # (4, 128)
    w1_all = jnp.stack(w1p).astype(jnp.bfloat16)      # (G, lanes_in, 128)
    w2_all = jnp.stack(w2p).astype(jnp.bfloat16)      # (G, 128, 128)
    p_all = jnp.stack(pslab)                          # (G, 4, 128) f32
    seg = jnp.kron(eye, jnp.full((latent, latent), 1.0 / latent, jnp.float32))

    group_map = lambda i, gid: (gid[i], 0, 0)

    out_packed = pl.pallas_call(
        _fused_mlp_ln_kernel,
        out_shape=jax.ShapeDtypeStruct((r_total // pack, lanes_out), jnp.float32),
        grid_spec=pltpu.PrefetchScalarGridSpec(
            num_scalar_prefetch=1,
            grid=(num_tiles,),
            in_specs=[
                pl.BlockSpec((tb, lanes_in), lambda i, gid: (i, 0)),          # packed x
                pl.BlockSpec((1, lanes_in, lanes_out), group_map),            # W1 per group
                pl.BlockSpec((1, lanes_out, lanes_out), group_map),           # W2 per group
                pl.BlockSpec((1, 4, lanes_out), group_map),                   # b1/b2/gamma/beta
                pl.BlockSpec((lanes_out, lanes_out), lambda i, gid: (0, 0)),  # seg-mean mat
            ],
            out_specs=pl.BlockSpec((tb, lanes_out), lambda i, gid: (i, 0)),
        ),
        compiler_params=pltpu.CompilerParams(
            dimension_semantics=("parallel",)),
    )(gid, x_packed, w1_all, w2_all, p_all, seg)

    # unpack (R_total/pack, 128) -> (R_total, latent) and split back per group
    y_all = out_packed.reshape(r_total, latent)
    outs, off = [], 0
    for n, tiles in zip(num_rows, tiles_per_group):
        outs.append(y_all[off:off + n])
        off += tiles * row_block
    return outs


def init_mlp_params(key, in_dim, latent):
    """Deterministic params for Linear->ReLU->Linear->LayerNorm (torch shapes)."""
    k1, k2, k3, k4 = jax.random.split(key, 4)
    s1 = 1.0 / jnp.sqrt(in_dim)
    s2 = 1.0 / jnp.sqrt(latent)
    w1 = jax.random.uniform(k1, (in_dim, latent), jnp.float32, -s1, s1)
    b1 = jax.random.uniform(k2, (1, latent), jnp.float32, -s1, s1)
    w2 = jax.random.uniform(k3, (latent, latent), jnp.float32, -s2, s2)
    b2 = jax.random.uniform(k4, (1, latent), jnp.float32, -s2, s2)
    gamma = jnp.ones((1, latent), jnp.float32)
    beta = jnp.zeros((1, latent), jnp.float32)
    return (w1, b1, w2, b2, gamma, beta)


class Encoder:
    """Pallas-backed Encoder: MLP on node features and on each edge set,
    executed as a single fused pallas_call."""

    def __init__(self, graph, latent_size, key):
        self.latent = latent_size
        keys = jax.random.split(key, 1 + len(graph.edge_sets))
        in_dims = [graph.node_features.shape[-1]] + \
                  [es.features.shape[-1] for es in graph.edge_sets]
        self.params = [init_mlp_params(k, d, latent_size)
                       for k, d in zip(keys, in_dims)]

    def __call__(self, graph):
        feats = [graph.node_features] + [es.features for es in graph.edge_sets]
        outs = encode_all(feats, self.params, self.latent)
        node_latents = outs[0]
        new_edge_sets = [es._replace(features=o)
                         for es, o in zip(graph.edge_sets, outs[1:])]
        return MultiGraph(node_latents, new_edge_sets)


def _ref_mlp_layernorm(x, params, matmul_dtype=jnp.float32):
    """Pure-JAX reference (optionally with bf16 matmul operands to match the kernel)."""
    w1, b1, w2, b2, gamma, beta = params
    d = matmul_dtype
    h = jnp.maximum(
        jnp.dot(x.astype(d), w1.astype(d), preferred_element_type=jnp.float32) + b1, 0.0)
    y = jnp.dot(h.astype(d), w2.astype(d), preferred_element_type=jnp.float32) + b2
    mean = jnp.mean(y, axis=-1, keepdims=True)
    var = jnp.mean((y - mean) ** 2, axis=-1, keepdims=True)
    return (y - mean) * jax.lax.rsqrt(var + LN_EPS) * gamma + beta


if __name__ == "__main__":
    key = jax.random.PRNGKey(0)
    k_node, k_e1, k_e2, k_params = jax.random.split(key, 4)

    # Small synthetic graph: 64 nodes (12 feats), two edge sets.
    num_nodes = 64
    node_features = jax.random.normal(k_node, (num_nodes, 12), jnp.float32)

    mesh_feats = jax.random.normal(k_e1, (128, 7), jnp.float32)
    world_feats = jax.random.normal(k_e2, (64, 4), jnp.float32)
    mesh_edges = EdgeSet(
        name="mesh_edges", features=mesh_feats,
        senders=jnp.zeros((128,), jnp.int32), receivers=jnp.zeros((128,), jnp.int32))
    world_edges = EdgeSet(
        name="world_edges", features=world_feats,
        senders=jnp.zeros((64,), jnp.int32), receivers=jnp.zeros((64,), jnp.int32))

    graph = MultiGraph(node_features, [mesh_edges, world_edges])

    encoder = Encoder(graph, LATENT_SIZE, k_params)
    out = encoder(graph)
    jax.block_until_ready(out.node_features)
    for es in out.edge_sets:
        jax.block_until_ready(es.features)

    # Sanity-check against a pure-JAX reference that matches the kernel's bf16
    # MXU operands (accumulation is f32 in both).
    ref_nodes = _ref_mlp_layernorm(node_features, encoder.params[0],
                                   matmul_dtype=jnp.bfloat16)
    assert out.node_features.shape == (num_nodes, LATENT_SIZE)
    assert jnp.allclose(out.node_features, ref_nodes, atol=1e-2, rtol=1e-2)
    for es, params, inp in zip(out.edge_sets, encoder.params[1:],
                               [mesh_feats, world_feats]):
        ref_edges = _ref_mlp_layernorm(inp, params, matmul_dtype=jnp.bfloat16)
        assert es.features.shape == (inp.shape[0], LATENT_SIZE)
        assert jnp.allclose(es.features, ref_edges, atol=1e-2, rtol=1e-2)

    print("KERNEL_OK")
</pallas_src>

<mosaic_0001>
module attributes {stable_mosaic.version = 11 : i64} {
  func.func @_fused_mlp_ln_kernel(%arg0: i32, %arg1: memref<3xi32, #tpu.memory_space<smem>>, %arg2: memref<256x128xbf16, #tpu.memory_space<vmem>>, %arg3: memref<1x128x128xbf16, #tpu.memory_space<vmem>>, %arg4: memref<1x128x128xbf16, #tpu.memory_space<vmem>>, %arg5: memref<1x4x128xf32, #tpu.memory_space<vmem>>, %arg6: memref<128x128xf32, #tpu.memory_space<vmem>>, %arg7: memref<256x128xf32, #tpu.memory_space<vmem>>) attributes {dimension_semantics = [#tpu.dimension_semantics<parallel>], iteration_bounds = array<i64: 3>, scalar_prefetch = 1 : i64, scratch_operands = 0 : i64, tpu.core_type = #tpu.core_type<tc>, window_params = [{transform_indices = @transform_0, window_bounds = array<i64: 256, 128>}, {transform_indices = @transform_1, window_bounds = array<i64: 1, 128, 128>}, {transform_indices = @transform_2, window_bounds = array<i64: 1, 128, 128>}, {transform_indices = @transform_3, window_bounds = array<i64: 1, 4, 128>}, {pipeline_mode = #tpu.pipeline_mode<synchronous>, transform_indices = @transform_4, window_bounds = array<i64: 128, 128>}, {transform_indices = @transform_5, window_bounds = array<i64: 256, 128>}]} {
    %c0 = arith.constant 0 : index
    %c0_0 = arith.constant 0 : index
    %0 = vector.load %arg2[%c0, %c0_0] : memref<256x128xbf16, #tpu.memory_space<vmem>>, vector<256x128xbf16>
    %c0_1 = arith.constant 0 : index
    %c0_2 = arith.constant 0 : index
    %c0_3 = arith.constant 0 : index
    %1 = vector.load %arg5[%c0_1, %c0_2, %c0_3] : memref<1x4x128xf32, #tpu.memory_space<vmem>>, vector<1x4x128xf32>
    %2 = vector.shape_cast %1 : vector<1x4x128xf32> to vector<4x128xf32>
    %3 = vector.extract_strided_slice %2 {offsets = [0, 0], sizes = [1, 128], strides = [1, 1]} : vector<4x128xf32> to vector<1x128xf32>
    %4 = vector.extract_strided_slice %2 {offsets = [1, 0], sizes = [1, 128], strides = [1, 1]} : vector<4x128xf32> to vector<1x128xf32>
    %5 = vector.extract_strided_slice %2 {offsets = [2, 0], sizes = [1, 128], strides = [1, 1]} : vector<4x128xf32> to vector<1x128xf32>
    %6 = vector.extract_strided_slice %2 {offsets = [3, 0], sizes = [1, 128], strides = [1, 1]} : vector<4x128xf32> to vector<1x128xf32>
    %c0_4 = arith.constant 0 : index
    %c0_5 = arith.constant 0 : index
    %c0_6 = arith.constant 0 : index
    %7 = vector.load %arg3[%c0_4, %c0_5, %c0_6] : memref<1x128x128xbf16, #tpu.memory_space<vmem>>, vector<1x128x128xbf16>
    %8 = vector.shape_cast %7 : vector<1x128x128xbf16> to vector<128x128xbf16>
    %cst = arith.constant dense<0.000000e+00> : vector<256x128xf32>
    %9 = tpu.matmul %0, %8, %cst {dimension_numbers = #tpu.dot_dimension_numbers<[1], [0], [0], [1], [0, 0, 1, 1], [], []>} : vector<256x128xbf16>, vector<128x128xbf16>, vector<256x128xf32> -> vector<256x128xf32>
    %10 = vector.broadcast %3 : vector<1x128xf32> to vector<256x128xf32>
    %11 = arith.addf %9, %10 : vector<256x128xf32>
    %cst_7 = arith.constant 0.000000e+00 : f32
    %12 = vector.broadcast %cst_7 : f32 to vector<256x128xf32>
    %13 = arith.maximumf %11, %12 : vector<256x128xf32>
    %14 = arith.truncf %13 : vector<256x128xf32> to vector<256x128xbf16>
    %c0_8 = arith.constant 0 : index
    %c0_9 = arith.constant 0 : index
    %c0_10 = arith.constant 0 : index
    %15 = vector.load %arg4[%c0_8, %c0_9, %c0_10] : memref<1x128x128xbf16, #tpu.memory_space<vmem>>, vector<1x128x128xbf16>
    %16 = vector.shape_cast %15 : vector<1x128x128xbf16> to vector<128x128xbf16>
    %cst_11 = arith.constant dense<0.000000e+00> : vector<256x128xf32>
    %17 = tpu.matmul %14, %16, %cst_11 {dimension_numbers = #tpu.dot_dimension_numbers<[1], [0], [0], [1], [0, 0, 1, 1], [], []>} : vector<256x128xbf16>, vector<128x128xbf16>, vector<256x128xf32> -> vector<256x128xf32>
    %18 = vector.broadcast %4 : vector<1x128xf32> to vector<256x128xf32>
    %19 = arith.addf %17, %18 : vector<256x128xf32>
    %c0_12 = arith.constant 0 : index
    %c0_13 = arith.constant 0 : index
    %20 = vector.load %arg6[%c0_12, %c0_13] : memref<128x128xf32, #tpu.memory_space<vmem>>, vector<128x128xf32>
    %cst_14 = arith.constant dense<0.000000e+00> : vector<256x128xf32>
    %21 = tpu.matmul %19, %20, %cst_14 {dimension_numbers = #tpu.dot_dimension_numbers<[1], [0], [0], [1], [0, 0, 1, 1], [], []>} : vector<256x128xf32>, vector<128x128xf32>, vector<256x128xf32> -> vector<256x128xf32>
    %22 = arith.mulf %19, %19 : vector<256x128xf32>
    %cst_15 = arith.constant dense<0.000000e+00> : vector<256x128xf32>
    %23 = tpu.matmul %22, %20, %cst_15 {dimension_numbers = #tpu.dot_dimension_numbers<[1], [0], [0], [1], [0, 0, 1, 1], [], []>} : vector<256x128xf32>, vector<128x128xf32>, vector<256x128xf32> -> vector<256x128xf32>
    %24 = arith.mulf %21, %21 : vector<256x128xf32>
    %25 = arith.subf %23, %24 : vector<256x128xf32>
    %cst_16 = arith.constant 0.000000e+00 : f32
    %26 = vector.broadcast %cst_16 : f32 to vector<256x128xf32>
    %27 = arith.maximumf %25, %26 : vector<256x128xf32>
    %28 = arith.subf %19, %21 : vector<256x128xf32>
    %cst_17 = arith.constant 9.99999974E-6 : f32
    %29 = vector.broadcast %cst_17 : f32 to vector<256x128xf32>
    %30 = arith.addf %27, %29 : vector<256x128xf32>
    %31 = math.rsqrt %30 : vector<256x128xf32>
    %32 = arith.mulf %28, %31 : vector<256x128xf32>
    %33 = vector.broadcast %5 : vector<1x128xf32> to vector<256x128xf32>
    %34 = arith.mulf %32, %33 : vector<256x128xf32>
    %35 = vector.broadcast %6 : vector<1x128xf32> to vector<256x128xf32>
    %36 = arith.addf %34, %35 : vector<256x128xf32>
    %c0_18 = arith.constant 0 : index
    %c0_19 = arith.constant 0 : index
    %37 = vector.load %arg7[%c0_18, %c0_19] : memref<256x128xf32, #tpu.memory_space<vmem>>, vector<256x128xf32>
    tpu.vector_store %arg7[%c0_18, %c0_19], %36 {strides = array<i32>} : memref<256x128xf32, #tpu.memory_space<vmem>>, vector<256x128xf32>,
    return
  }
  func.func @transform_0(%arg0: i32, %arg1: memref<3xi32, #tpu.memory_space<smem>>) -> (i32, i32) {
    %c0_i32 = arith.constant 0 : i32
    %c0_i32_0 = arith.constant 0 : i32
    return %arg0, %c0_i32 : i32, i32
  }
  func.func @transform_1(%arg0: i32, %arg1: memref<3xi32, #tpu.memory_space<smem>>) -> (i32, i32, i32) {
    %0 = arith.index_cast %arg0 : i32 to index
    %1 = memref.load %arg1[%0] : memref<3xi32, #tpu.memory_space<smem>>
    %c0_i32 = arith.constant 0 : i32
    %c0_i32_0 = arith.constant 0 : i32
    %c0_i32_1 = arith.constant 0 : i32
    return %1, %c0_i32, %c0_i32_0 : i32, i32, i32
  }
  func.func @transform_2(%arg0: i32, %arg1: memref<3xi32, #tpu.memory_space<smem>>) -> (i32, i32, i32) {
    %0 = arith.index_cast %arg0 : i32 to index
    %1 = memref.load %arg1[%0] : memref<3xi32, #tpu.memory_space<smem>>
    %c0_i32 = arith.constant 0 : i32
    %c0_i32_0 = arith.constant 0 : i32
    %c0_i32_1 = arith.constant 0 : i32
    return %1, %c0_i32, %c0_i32_0 : i32, i32, i32
  }
  func.func @transform_3(%arg0: i32, %arg1: memref<3xi32, #tpu.memory_space<smem>>) -> (i32, i32, i32) {
    %0 = arith.index_cast %arg0 : i32 to index
    %1 = memref.load %arg1[%0] : memref<3xi32, #tpu.memory_space<smem>>
    %c0_i32 = arith.constant 0 : i32
    %c0_i32_0 = arith.constant 0 : i32
    %c0_i32_1 = arith.constant 0 : i32
    return %1, %c0_i32, %c0_i32_0 : i32, i32, i32
  }
  func.func @transform_4(%arg0: i32, %arg1: memref<3xi32, #tpu.memory_space<smem>>) -> (i32, i32) {
    %c0_i32 = arith.constant 0 : i32
    %c0_i32_0 = arith.constant 0 : i32
    %c0_i32_1 = arith.constant 0 : i32
    return %c0_i32, %c0_i32_0 : i32, i32
  }
  func.func @transform_5(%arg0: i32, %arg1: memref<3xi32, #tpu.memory_space<smem>>) -> (i32, i32) {
    %c0_i32 = arith.constant 0 : i32
    %c0_i32_0 = arith.constant 0 : i32
    return %arg0, %c0_i32 : i32, i32
  }
}

</mosaic_0001>

<bundles_post_ra>
// kernel: tpu_custom_call.1
= control target key start
LH: loop header
LB: loop body
LE: loop exit
PB: predicated region body
PF: predicated region fallthrough
CT: control target
= control target key end

     0   :  { %s2675_s24 = smov [#allocation3]   ;;  %s3721_s0 = inlined_call_operand.hbm [shape: s32[3], index: 0, kind: input, shape index: {}]   ;;  %s3722_s1 = inlined_call_operand.hbm [shape: bf16[768,128], index: 1, kind: input, shape index: {}]   ;;  %s3723_s2 = inlined_call_operand.hbm [shape: bf16[3,128,128], index: 2, kind: input, shape index: {}]   ;;  %s3724_s3 = inlined_call_operand.hbm [shape: bf16[3,128,128], index: 3, kind: input, shape index: {}]   ;;  %s3725_s4 = inlined_call_operand.hbm [shape: f32[3,4,128], index: 4, kind: input, shape index: {}]   ;;  %s3726_s5 = inlined_call_operand.hbm [shape: f32[128,128], index: 5, kind: input, shape index: {}]   ;;  %s3727_s6 = inlined_call_operand.hbm [shape: f32[768,128], index: 6, kind: output, shape index: {}]  }
   0x1   :  { %3753 = sst [smem:[#allocation40_spill]] %s3722_s1  ;;  %s12_s23 = sshll.u32 %s3721_s0, 4  ;;  %s13_s23 = int_to_ptr.hbm [resolvable:$true] %s12_s23 }
   0x2   :  { %3754 = sst [smem:[#allocation41_spill]] %s3723_s2 }
   0x3   :  { %3755 = sst [smem:[#allocation42_spill]] %s3726_s5 }
   0x4   :  { %3756 = sst [smem:[#allocation43_spill]] %s3727_s6 }
   0x5   :  { %15 = dma.hbm_to_smem %s13_s23, 16, %s2675_s24, [#allocation2] }
   0x6   :  { %2597 = dma.done.wait [#allocation2], 16 }
   0x7   :  { %2598 = vsyncadd [#allocation2], 4294967280 }
   0x8   :  { %18 = sfence }
   0x9   :  { %19 = vsyncpa [#allocation5], 0 }
   0xa   :  { %21 = vsyncpa [#allocation5 + $0x1], 0 }
   0xb   :  { %22 = vsyncpa [#allocation8], 0 }
   0xc   :  { %24 = vsyncpa [#allocation8 + $0x1], 0 }
   0xd   :  { %25 = vsyncpa [#allocation11], 0 }
   0xe   :  { %27 = vsyncpa [#allocation11 + $0x1], 0 }
   0xf   :  { %28 = vsyncpa [#allocation6], 0 }
  0x10   :  { %30 = vsyncpa [#allocation6 + $0x1], 0  ;;  %s2721_s25 = smov 0   ;;  %s2723_s26 = smov 0  }
  0x11   :  { %s2725_s27 = smov 0   ;;  %s2727_s0 = smov 0  }
  0x12   :  { %s2729_s28 = smov 0   ;;  %s2731_s29 = smov 0  }
  0x13   :  { %s2733_s30 = smov 0   ;;  %s2735_s7 = smov 0  }
  0x14   :  { %s2737_s8 = smov 0   ;;  %s2739_s9 = smov 0  }
  0x15   :  { %s2741_s10 = smov 0   ;;  %s2743_s11 = smov 0  }
  0x16   :  { %s2745_s12 = smov 0  }
  0x17 LB: > { %3757 = sst [smem:[#allocation27_spill]] %s2645_s29  ;;  %s2790_s16 = sadd.s32 4294967295, %s2673_s12   ;;  %s2673_s12 = sphi %s2745_s12, %s3819_s12   ;;  %s2669_s11 = sphi %s2743_s11, %s3826_s11   ;;  %s2665_s10 = sphi %s2741_s10, %s3834_s10   ;;  %s2661_s9 = sphi %s2739_s9, %s3833_s9   ;;  %s2657_s8 = sphi %s2737_s8, %s3824_s8   ;;  %s2653_s7 = sphi %s2735_s7, %s3823_s7   ;;  %s2649_s30 = sphi %s2733_s30, %s3822_s30   ;;  %s2645_s29 = sphi %s2731_s29, %s3821_s29   ;;  %s2641_s28 = sphi %s2729_s28, %s3832_s28   ;;  %s2637_s0 = sphi %s2727_s0, %s3831_s0   ;;  %s2633_s27 = sphi %s2725_s27, %s3830_s27   ;;  %s2629_s26 = sphi %s2723_s26, %s3829_s26   ;;  %s2625_s25 = sphi %s2721_s25, %s3828_s25  }
  0x18   : > { %3758 = sst [smem:[#allocation28_spill]] %s2653_s7  ;;  %p1938_p0 = scmp.ge.s32.totalorder %s2673_s12, 1 }
  0x19   : > { %3759 = sst [smem:[#allocation29_spill]] %s2657_s8  ;;  %p3736_p1 = scmp.eq.s32.totalorder %s2790_s16, 0 }
  0x1a   : > { %3760 = sst [smem:[#allocation30_spill]] %s2661_s9  ;;  %p198_p2 = scmp.lt.s32.totalorder %s2673_s12, 4 }
  0x1b   : > { %3761 = sst [smem:[#allocation31_spill]] %s2669_s11  ;;  %s2676_s18 = smov [#allocation12]  }
  0x1c   : > { %s3762_s5 = sld [smem:[#allocation42_spill]]  ;;  %p2795_p3 = pnand %p1938_p0, %p198_p2 }
  0x1d   : > { %s211_s19 = sshll.u32 %s2676_s18, 4  ;;  %s2677_s20 = smov 128   ;;  %s212_s19 = int_to_ptr.vmem [resolvable:$true] %s211_s19 }
  0x1e   : > { %p2148_p4 = pneg %p2795_p3  ;;  %s2678_s21 = smov 8  }
  0x1f   : > { %s2804_s22 = sadd.s32 1, %s2673_s12   ;;  %p3733_p6 = scmp.eq.s32.totalorder %s2673_s12, 0 }
  0x20   : > { %p2149_p5 = pnand %p2148_p4, %p3736_p1  ;;  %3764 = sst [smem:[#allocation32_spill]] %s2804_s22 }
  0x21   : > { %s66_s23 = sld [smem:[#allocation3 + %s2673_s12]]  ;;  %s71_s13 = sadd.s32 1, %s2657_s8 }
  0x22   : > { %s209_s15 = sshll.u32 %s3762_s5, 4  ;;  %s67_s24 = sld [smem:[#allocation3 + %s2804_s22]]  ;;  %s210_s15 = int_to_ptr.hbm [resolvable:$true] %s209_s15 }
  0x23   : > { %2151 = dma.hbm_to_vmem [thread:$0]  (!%p2149_p5), %s210_s15, 2048, %s212_s19, [#allocation11], %s2677_s20, %s2677_s20, %s2678_s21  }
  0x24   : > { %p78_p7 = scmp.ne.s32.totalorder %s2657_s8, %s2653_s7  ;;  %p84_p8 = scmp.ne.s32.totalorder %s2653_s7, %s2649_s30 }
  0x25   : > { %p3734_p9 = scmp.lt.s32.totalorder %s2673_s12, 3  ;;  %s249_s30 = sand.u32 1, %s2657_s8  }
  0x26   : > { %p2817_p10 = por %p78_p7, %p3733_p6  ;;  %p2823_p11 = por %p84_p8, %p3736_p1 }
  0x27   : > { %s1944_s20 = sshll.u32 %s249_s30, 6  ;;  %s40_s18 = ssub.s32 %s2673_s12, %s2804_s22 }
  0x28   : > { %s3766_s15 = scalar_select %p2823_p11, 1, 0 }
  0x29   : > { %s68_s19 = ssub.s32 %s66_s23, %s67_s24  ;;  %s251_s23 = scalar_lea.vmem [#allocation7], %s1944_s20 }
  0x2a   : > { %3767 = sst [smem:[#allocation33_spill]] %s3766_s15  ;;  %p69_p12 = scmp.eq.s32.totalorder %s68_s19, 0 }
  0x2b   : > { %s2131_s21 = scalar_select %p2817_p10, [#allocation3], [#allocation14] }
  0x2c   : > { %s2832_s5 = scalar_select %p69_p12, %s2657_s8, %s71_s13  }
  0x2d   : > { %s2132_s6 = scalar_select %p2817_p10, %s2673_s12, 0 }
  0x2e   : > { %3768 = sst [smem:[#allocation34_spill]] %s2832_s5  ;;  %s3836_s21 = smov (!%p3734_p9, %s2131_s21), [#allocation17] }
  0x2f   : > { %s3838_s6 = smov (!%p3734_p9, %s2132_s6), 0  ;;  %s2841_s24 = sshll.u32 %s251_s23, 4  ;;  %s261_s24 = int_to_ptr.vmem [resolvable:$true] %s2841_s24 }
  0x30   : > { %p2847_p13 = pnand %p3734_p9, %p2817_p10  ;;  %s252_s30 = sld [smem:[%s3836_s21 + %s3838_s6]] }
  0x31   : > { %p2856_p0 = scmp.eq.s32.totalorder %s40_s18, 0  ;;  %s3771_s2 = sld [smem:[#allocation41_spill]] }
  0x32   : > { %p3735_p2 = scmp.ne.s32.totalorder %s2669_s11, %s2665_s10  ;;  %p56_p4 = scmp.ne.s32.totalorder %s2665_s10, %s2661_s9 }
  0x33   : > { %s3773_s21 = sand.u32 1, %s2673_s12   ;;  %p2401_p8 = pneg %p2847_p13 }
  0x34   : > { %p2872_p5 = por %p3733_p6, %p3735_p2 }
  0x36   : > { %s2093_s8 = sshll.u32 %s252_s30, 6  ;;  %s2878_s30 = scalar_lea.sflag [#allocation8], %s3773_s21 }
  0x37   : > { %s257_s14 = scalar_lea.hbm %s3771_s2, %s2093_s8  ;;  %s2404_s23 = scalar_lea.hbm %s3771_s2, 192 }
  0x38   : > { %s258_s7 = sshll.u32 %s257_s14, 4  ;;  %s259_s7 = int_to_ptr.hbm [resolvable:$true] %s258_s7 }
  0x39   : > { %s2397_s18 = sshra.s32 %s259_s7, 4  ;;  %s2398_s18 = int_to_ptr.hbm [resolvable:$true] %s2397_s18 }
  0x3a   : > { %s2399_s19 = scalar_lea.hbm %s2398_s18, 64  ;;  %p2405_p6 = scmp.lt.s32.totalorder %s2398_s18, %s3771_s2 }
  0x3b   : > { %p2400_p7 = scmp.ne.s32.totalorder %s2398_s18, %s2399_s19  ;;  %p2406_p9 = scmp.lt.s32.totalorder %s2404_s23, %s2399_s19 }
  0x3d   : > { %p2402_p10 = pnand %p2401_p8, %p2400_p7  ;;  %p2407_p2 = por %p2406_p9, %p2405_p6 }
  0x3f   : > { %p2403_p12 = pneg %p2402_p10 }
  0x41   : > { %p2408_p1 = pnand %p2407_p2, %p2403_p12 }
  0x43   : > { %2411 = shalt.err (!%p2408_p1)
}
  0x44   : > { %s3737_s21 = smov 64   ;;  %s3739_s5 = smov 4  }
  0x45   : > { %2160 = dma.hbm_to_vmem [thread:$0]  (!%p2847_p13), %s259_s7, 1024, %s261_s24, %s2878_s30, %s3737_s21, %s3737_s21, %s3739_s5  }
  0x46   : > { %s3774_s19 = sadd.s32 1, %s2669_s11  ;;  %p3776_p1 = scmp.eq.s32.totalorder %s2790_s16, 0 }
  0x47   : > { %s2901_s18 = scalar_select %p2856_p0, %s2669_s11, %s3774_s19  }
  0x48   : > { %p2908_p6 = por %p3776_p1, %p56_p4  ;;  %p185_p9 = scmp.eq.s32.totalorder %s2790_s16, 2 }
  0x49   : > { %3775 = sst [smem:[#allocation35_spill]] %s2901_s18  ;;  %s3778_s20 = sadd.s32 4294967294, %s2673_s12  }
  0x4a   : > { %p191_p2 = scmp.eq.s32.totalorder %s3778_s20, 2  ;;  %s225_s13 = sand.u32 1, %s2669_s11  }
  0x4b   : > { %p3779_p7 = scmp.ne.s32.totalorder %s2669_s11, %s2665_s10  ;;  %s1941_s15 = sshll.u32 %s225_s13, 7 }
  0x4c   : > { %p2926_p13 = por %p191_p2, %p56_p4  ;;  %s2092_s24 = sshll.u32 %s2673_s12, 7 }
  0x4d   : > { %p2919_p8 = por %p185_p9, %p3779_p7  ;;  %s3784_s1 = sld [smem:[#allocation40_spill]] }
  0x4e   : > { %s3782_s7 = scalar_select %p2926_p13, 1, 0 }
  0x4f   : > { %s3780_s23 = scalar_select %p2919_p8, 1, 0 }
  0x50   : > { %3783 = sst [smem:[#allocation37_spill]] %s3782_s7  ;;  %s229_s5 = scalar_lea.vmem [#allocation4], %s1941_s15 }
  0x51   : > { %3781 = sst [smem:[#allocation36_spill]] %s3780_s23  ;;  %s237_s2 = sshll.u32 %s229_s5, 4  ;;  %s238_s2 = int_to_ptr.vmem [resolvable:$true] %s237_s2 }
  0x52   : > { %p3785_p0 = scmp.lt.s32.totalorder %s2673_s12, 3  ;;  %s226_s11 = scalar_lea.sflag [#allocation5], %s225_s13 }
  0x53   : > { %s234_s21 = scalar_lea.hbm %s3784_s1, %s2092_s24  ;;  %s2434_s15 = scalar_lea.hbm %s3784_s1, 384 }
  0x54   : > { %s235_s20 = sshll.u32 %s234_s21, 4  ;;  %p2938_p10 = pnand %p3785_p0, %p2872_p5  ;;  %s236_s20 = int_to_ptr.hbm [resolvable:$true] %s235_s20 }
  0x55   : > { %s2427_s7 = sshra.s32 %s236_s20, 4  ;;  %s2428_s7 = int_to_ptr.hbm [resolvable:$true] %s2427_s7 }
  0x56   : > { %s2429_s9 = scalar_lea.hbm %s2428_s7, 128  ;;  %p2431_p12 = pneg %p2938_p10 }
  0x57   : > { %p2430_p4 = scmp.ne.s32.totalorder %s2428_s7, %s2429_s9  ;;  %p2435_p5 = scmp.lt.s32.totalorder %s2428_s7, %s3784_s1 }
  0x58   : > { %p2436_p2 = scmp.lt.s32.totalorder %s2434_s15, %s2429_s9 }
  0x59   : > { %p2432_p1 = pnand %p2431_p12, %p2430_p4 }
  0x5a   : > { %p2437_p7 = por %p2436_p2, %p2435_p5 }
  0x5b   : > { %p2433_p9 = pneg %p2432_p1 }
  0x5d   : > { %p2438_p0 = pnand %p2437_p7, %p2433_p9 }
  0x5f   : > { %2441 = shalt.err (!%p2438_p0)
}
  0x60   : > { %s3787_s13 = smov 4   ;;  %s3788_s14 = smov 64  }
  0x61   : > { %2155 = dma.hbm_to_vmem [thread:$0]  (!%p2938_p10), %s236_s20, 2048, %s238_s2, %s226_s11, %s3788_s14, %s3788_s14, %s3787_s13  }
  0x62   : > { %s94_s9 = sld [smem:[#allocation3 + %s2673_s12]]  ;;  %p106_p4 = scmp.ne.s32.totalorder %s2645_s29, %s2641_s28 }
  0x63   : > { %s95_s18 = sld [smem:[#allocation3 + %s2804_s22]]  ;;  %p112_p12 = scmp.ne.s32.totalorder %s2641_s28, %s2637_s0 }
  0x64   : > { %s272_s7 = sand.u32 1, %s2645_s29   ;;  %s99_s19 = sadd.s32 1, %s2645_s29 }
  0x65   : > { %p3789_p1 = scmp.eq.s32.totalorder %s2790_s16, 0  ;;  %p3791_p5 = scmp.eq.s32.totalorder %s2673_s12, 0 }
  0x66   : > { %s1947_s2 = sshll.u32 %s272_s7, 6  ;;  %p3792_p7 = scmp.lt.s32.totalorder %s2673_s12, 3 }
  0x67   : > { %p2965_p9 = por %p112_p12, %p3789_p1  ;;  %p108_p2 = por %p106_p4, %p3791_p5 }
  0x68   : > { %p3795_p12 = pmov %p3792_p7  ;;  %p3796_p4 = pmov %p3792_p7 }
  0x69   : > { %s96_s11 = ssub.s32 %s94_s9, %s95_s18  ;;  %p2973_p0 = pnand %p3792_p7, %p108_p2 }
  0x6a   : > { %p97_p10 = scmp.eq.s32.totalorder %s96_s11, 0  ;;  %s274_s24 = scalar_lea.vmem [#allocation9], %s1947_s2 }
  0x6b   : > { %s2134_s20 = scalar_select %p108_p2, [#allocation3], [#allocation15] }
  0x6c   : > { %s2978_s21 = scalar_select %p97_p10, %s2645_s29, %s99_s19  }
  0x6d   : > { %s2135_s15 = scalar_select %p108_p2, %s2673_s12, 0 }
  0x6e   : > { %3794 = sst [smem:[#allocation38_spill]] %s2978_s21  ;;  %s3840_s20 = smov (!%p3795_p12, %s2134_s20), [#allocation18] }
  0x6f   : > { %s3842_s15 = smov (!%p3796_p4, %s2135_s15), 0  ;;  %s2985_s9 = sshll.u32 %s274_s24, 4  ;;  %s284_s9 = int_to_ptr.vmem [resolvable:$true] %s2985_s9 }
  0x70   : > { %s275_s6 = sld [smem:[%s3840_s20 + %s3842_s15]]  ;;  %p134_p1 = scmp.ne.s32.totalorder %s2633_s27, %s2629_s26 }
  0x71   : > { %s2988_s18 = sld [smem:[#allocation3 + %s2673_s12]]  ;;  %p140_p5 = scmp.ne.s32.totalorder %s2629_s26, %s2625_s25 }
  0x72   : > { %s2991_s7 = sld [smem:[#allocation3 + %s2804_s22]]  ;;  %s127_s19 = sadd.s32 1, %s2633_s27 }
  0x73   : > { %p3797_p2 = scmp.eq.s32.totalorder %s2790_s16, 0  ;;  %p3800_p7 = scmp.eq.s32.totalorder %s2673_s12, 0 }
  0x74   : > { %s295_s29 = sand.u32 1, %s2633_s27  }
  0x75   : > { %p3001_p10 = por %p140_p5, %p3797_p2  ;;  %p3010_p12 = por %p134_p1, %p3800_p7 }
  0x76   : > { %s2094_s11 = sshll.u32 %s275_s6, 6  ;;  %p2461_p5 = pneg %p2973_p0 }
  0x77   : > { %s3798_s1 = scalar_select %p3001_p10, 1, 0 }
  0x78   : > { %s280_s15 = scalar_lea.hbm %s3724_s3, %s2094_s11  ;;  %s124_s25 = ssub.s32 %s2988_s18, %s2991_s7 }
  0x79   : > { %3799 = sst [smem:[#allocation39_spill]] %s3798_s1  ;;  %s281_s21 = sshll.u32 %s280_s15, 4  ;;  %s282_s21 = int_to_ptr.hbm [resolvable:$true] %s281_s21 }
  0x7a   : > { %s2457_s22 = sshra.s32 %s282_s21, 4  ;;  %s2464_s11 = scalar_lea.hbm %s3724_s3, 192  ;;  %s2458_s22 = int_to_ptr.hbm [resolvable:$true] %s2457_s22 }
  0x7b   : > { %s2459_s6 = scalar_lea.hbm %s2458_s22, 64  ;;  %p2465_p1 = scmp.lt.s32.totalorder %s2458_s22, %s3724_s3 }
  0x7c   : > { %p2460_p4 = scmp.ne.s32.totalorder %s2458_s22, %s2459_s6  ;;  %p2466_p7 = scmp.lt.s32.totalorder %s2464_s11, %s2459_s6 }
  0x7e   : > { %p2462_p2 = pnand %p2461_p5, %p2460_p4  ;;  %p2467_p8 = por %p2466_p7, %p2465_p1 }
  0x80   : > { %p2463_p13 = pneg %p2462_p2 }
  0x82   : > { %p2468_p10 = pnand %p2467_p8, %p2463_p13 }
  0x84   : > { %2471 = shalt.err (!%p2468_p10)
}
  0x85   : > { %2165 = dma.hbm_to_vmem [thread:$0]  (!%p2973_p0), %s282_s21, 1024, %s284_s9, %s2878_s30, %s3788_s14, %s3788_s14, %s3787_s13  }
  0x86   : > { %p125_p4 = scmp.eq.s32.totalorder %s124_s25, 0  ;;  %s1950_s1 = sshll.u32 %s295_s29, 2 }
  0x87   : > { %s2137_s22 = scalar_select %p3010_p12, [#allocation3], [#allocation16] }
  0x88   : > { %s3034_s23 = scalar_select %p125_p4, %s2633_s27, %s127_s19  }
  0x89   : > { %s2138_s0 = scalar_select %p3010_p12, %s2673_s12, 0 }
  0x8a   : > { %p3802_p8 = scmp.lt.s32.totalorder %s2673_s12, 3  ;;  %s297_s13 = scalar_lea.vmem [#allocation10], %s1950_s1 }
  0x8b   : > { %s306_s29 = sshll.u32 %s297_s13, 4  ;;  %s3806_s15 = sand.u32 1, %s2673_s12   ;;  %s307_s29 = int_to_ptr.vmem [resolvable:$true] %s306_s29 }
  0x8c   : > { %s3844_s22 = smov (!%p3802_p8, %s2137_s22), [#allocation19]  ;;  %p3803_p13 = pmov %p3802_p8 }
  0x8d   : > { %p3804_p10 = pmov %p3802_p8  ;;  %s294_s25 = scalar_lea.sflag [#allocation11], %s3806_s15 }
  0x8e   : > { %s3846_s0 = smov (!%p3803_p13, %s2138_s0), 0  ;;  %s2494_s20 = scalar_lea.hbm %s3725_s4, 12 }
  0x8f   : > { %p3047_p5 = pnand %p3804_p10, %p3010_p12  ;;  %s298_s30 = sld [smem:[%s3844_s22 + %s3846_s0]] }
  0x91   : > { %p2491_p12 = pneg %p3047_p5 }
  0x95   : > { %s1951_s14 = sshll.u32 %s298_s30, 2 }
  0x96   : > { %s302_s7 = scalar_lea.hbm %s3725_s4, %s1951_s14 }
  0x97   : > { %s304_s19 = sshll.u32 %s302_s7, 4  ;;  %s305_s19 = int_to_ptr.hbm [resolvable:$true] %s304_s19 }
  0x98   : > { %s2487_s24 = sshra.s32 %s305_s19, 4  ;;  %s2488_s24 = int_to_ptr.hbm [resolvable:$true] %s2487_s24 }
  0x99   : > { %s2489_s6 = scalar_lea.hbm %s2488_s24, 4  ;;  %p2495_p7 = scmp.lt.s32.totalorder %s2488_s24, %s3725_s4 }
  0x9a   : > { %p2490_p0 = scmp.ne.s32.totalorder %s2488_s24, %s2489_s6  ;;  %p2496_p4 = scmp.lt.s32.totalorder %s2494_s20, %s2489_s6 }
  0x9c   : > { %p2492_p2 = pnand %p2491_p12, %p2490_p0  ;;  %p2497_p8 = por %p2496_p4, %p2495_p7 }
  0x9e   : > { %p2493_p1 = pneg %p2492_p2 }
  0xa0   : > { %p2498_p13 = pnand %p2497_p8, %p2493_p1 }
  0xa2   : > { %2501 = shalt.err (!%p2498_p13)
}
  0xa3   : > { %2170 = dma.hbm_to_vmem [thread:$0]  (!%p3047_p5), %s305_s19, 64, %s307_s29, %s294_s25  }
  0xa4   : > { %315 = sbr.rel (%p2795_p3) target bundleno = 912 (0x390), region = 40  ;;  %s3069_s0 = sand.u32 (!%p2795_p3), 1, %s2665_s10  }
  0xa5   : > { %s1953_s30 = sshll.u32 (!%p2795_p3), %s3069_s0, 7  ;;  %s318_s13 = scalar_lea.sflag (!%p2795_p3), [#allocation5], %s3069_s0 }
  0xa6   : > { %s3073_s14 = scalar_lea.vmem (!%p2795_p3), [#allocation4], %s1953_s30 }
  0xa9   : > { %2600 = dma.done.wait (%p2908_p6), %s318_s13, 2048  }
  0xaa   : > { %2602 = vsyncadd (%p2908_p6), %s318_s13, 4294965248  ;;  %s3807_s18 = sld [smem:[#allocation28_spill]]  ;;  %s327_s17 = sand.u32 1, %s2790_s16  }
  0xab   : > { %s328_s7 = scalar_lea.sflag [#allocation8], %s327_s17 }
  0xb0   : > { %s329_s21 = sand.u32 1, %s3807_s18  }
  0xb1   : > { %s1954_s9 = sshll.u32 %s329_s21, 6 }
  0xb2   : > { %s331_s19 = scalar_lea.vmem [#allocation7], %s1954_s9 }
  0xb3   : > { %2604 = dma.done.wait (%p2823_p11), %s328_s7, 1024  }
  0xb4   : > { %2606 = vsyncadd (%p2823_p11), %s328_s7, 4294966272  ;;  %s339_s15 = sand.u32 1, %s2641_s28  }
  0xb5   : > { %s1955_s25 = sshll.u32 %s339_s15, 6 }
  0xb6   : > { %s3086_s24 = scalar_lea.vmem [#allocation9], %s1955_s25 }
  0xb7   : > { %2608 = dma.done.wait (%p2965_p9), %s328_s7, 1024  }
  0xb8   : > { %2610 = vsyncadd (%p2965_p9), %s328_s7, 4294966272  ;;  %s3809_s8 = sld [smem:[#allocation39_spill]]  ;;  %s349_s6 = sand.u32 1, %s2629_s26  }
  0xb9   : > { %s3093_s2 = sshll.u32 %s349_s6, 2  ;;  %s348_s11 = scalar_lea.sflag [#allocation11], %s327_s17 }
  0xba   : > { %s351_s20 = scalar_lea.vmem [#allocation10], %s3093_s2 }
  0xbe   : > { %p3810_p3 = scmp.ne.s32.totalorder %s3809_s8, 0 }
  0xc0   : > { %2612 = dma.done.wait (%p3810_p3), %s348_s11, 64  }
  0xc1   : > { %2614 = vsyncadd (%p3810_p3), %s348_s11, 4294967232  ;;  %p3811_p11 = scmp.eq.s32.totalorder %s2790_s16, 0 }
  0xc3   : > { %2616 = dma.done.wait (%p3811_p11), [#allocation11], 2048   ;;  %p3812_p6 = pmov %p3811_p11 }
  0xc4   : > { %v2118_v0 = vld [vmem:[%s331_s19 + $0x38] sm:$0xff]  ;;  %v2117_v1 = vld [vmem:[%s331_s19 + $0x30] sm:$0xff]  ;;  %v2116_v2 = vld [vmem:[%s331_s19 + $0x28] sm:$0xff]  ;;  %s1958_s5 = sshll.u32 %s3069_s0, 8  ;;  %s2127_s22 = sshll.u32 %s2790_s16, 8 }
  0xc5   : > { %2618 = vsyncadd (%p3812_p6), [#allocation11], 4294965248  ;;  %598 = vmatpush.bf16.msra.mxu0 %v2118_v0  ;;  %v2115_v3 = vld [vmem:[%s331_s19 + $0x20] sm:$0xff]  ;;  %v2114_v4 = vld [vmem:[%s331_s19 + $0x18] sm:$0xff]  ;;  %s3326_s1 = scalar_lea.vmem [#allocation13], %s1958_s5  ;;  %s3814_s29 = sld [smem:[#allocation36_spill]] }
  0xc6   : > { %v2113_v5 = vld [vmem:[%s331_s19 + $0x10] sm:$0xff]  ;;  %v2112_v6 = vld [vmem:[%s331_s19 + $0x8] sm:$0xff]  ;;  %v2111_v7 = vld [vmem:[%s331_s19] sm:$0xff]  ;;  %s1786_s16 = sshll.u32 %s3326_s1, 4  ;;  %s1774_s21 = scalar_lea.sflag [#allocation6], %s3069_s0  ;;  %s1787_s16 = int_to_ptr.vmem [resolvable:$true] %s1786_s16 }
  0xc7   : > { %v2095_v8 = vld [vmem:[%s3073_s14] sm:$0xff]  ;;  %v2096_v9 = vld [vmem:[%s3073_s14 + $0x8] sm:$0xff]  ;;  %v2097_v10 = vld [vmem:[%s3073_s14 + $0x10] sm:$0xff] }
  0xc8   : > { %v2098_v11 = vld [vmem:[%s3073_s14 + $0x18] sm:$0xff]  ;;  %v2099_v12 = vld [vmem:[%s3073_s14 + $0x20] sm:$0xff]  ;;  %v2100_v14 = vld [vmem:[%s3073_s14 + $0x28] sm:$0xff] }
  0xc9   : > { %599 = vmatpush.bf16.msra.mxu0 %v2117_v1  ;;  %v2126_v13 = vld [vmem:[%s3086_s24 + $0x38] sm:$0xff]  ;;  %v2125_v15 = vld [vmem:[%s3086_s24 + $0x30] sm:$0xff]  ;;  %v2124_v16 = vld [vmem:[%s3086_s24 + $0x28] sm:$0xff] }
  0xca   : > { %800 = vmatpush.bf16.msra.mxu1 %v2126_v13  ;;  %v2123_v17 = vld [vmem:[%s3086_s24 + $0x20] sm:$0xff]  ;;  %v2122_v18 = vld [vmem:[%s3086_s24 + $0x18] sm:$0xff]  ;;  %v2101_v19 = vld [vmem:[%s3073_s14 + $0x30] sm:$0xff] }
  0xcb   : > { %v2121_v20 = vld [vmem:[%s3086_s24 + $0x10] sm:$0xff]  ;;  %v2120_v21 = vld [vmem:[%s3086_s24 + $0x8] sm:$0xff]  ;;  %v2119_v22 = vld [vmem:[%s3086_s24] sm:$0xff]  ;;  %p3815_p10 = scmp.ne.s32.totalorder %s3814_s29, 0 }
  0xcc   : > { %v2102_v23 = vld [vmem:[%s3073_s14 + $0x38] sm:$0xff]  ;;  %v2103_v24 = vld [vmem:[%s3073_s14 + $0x40] sm:$0xff]  ;;  %v2104_v34 = vld [vmem:[%s3073_s14 + $0x48] sm:$0xff] }
  0xcd   : > { %600 = vmatpush.bf16.msra.mxu0 %v2116_v2  ;;  %v3123_v25 = vld [vmem:[%s351_s20] sm:$0xf]  ;;  %v2105_v42 = vld [vmem:[%s3073_s14 + $0x50] sm:$0xff]  ;;  %v2106_v50 = vld [vmem:[%s3073_s14 + $0x58] sm:$0xff] }
  0xce   : > { %801 = vmatpush.bf16.msra.mxu1 %v2125_v15  ;;  %v3126_v27 = vperm.slane %v3123_v25, 0  ;;  %v2107_v58 = vld [vmem:[%s3073_s14 + $0x60] sm:$0xff]  ;;  %v2108_v2 = vld [vmem:[%s3073_s14 + $0x68] sm:$0xff]  ;;  %v898_v15 = vld [vmem:[#allocation12 + $0x48] sm:$0xff] }
  0xd1   : > { %601 = vmatpush.bf16.msra.mxu0 %v2115_v3  ;;  %v904_v3 = vld [vmem:[#allocation12 + $0x78] sm:$0xff] }
  0xd2   : > { %802 = vmatpush.bf16.msra.mxu1 %v2124_v16  ;;  %905 = vmatpush.msra.mxu2 %v904_v3  ;;  %v897_v16 = vld [vmem:[#allocation12 + $0x40] sm:$0xff] }
  0xd3   : > { %1050 = vmatpush.msra.mxu3 %v904_v3 }
  0xd5   : > { %602 = vmatpush.bf16.msra.mxu0 %v2114_v4 }
  0xd6   : > { %803 = vmatpush.bf16.msra.mxu1 %v2123_v17 }
  0xd9   : > { %603 = vmatpush.bf16.msra.mxu0 %v2113_v5  ;;  %v903_v5 = vld [vmem:[#allocation12 + $0x70] sm:$0xff] }
  0xda   : > { %804 = vmatpush.bf16.msra.mxu1 %v2122_v18  ;;  %906 = vmatpush.msra.mxu2 %v903_v5  ;;  %v2109_v18 = vld [vmem:[%s3073_s14 + $0x70] sm:$0xff] }
  0xdb   : > { %1051 = vmatpush.msra.mxu3 %v903_v5 }
  0xdd   : > { %604 = vmatpush.bf16.msra.mxu0 %v2112_v6  ;;  %v902_v6 = vld [vmem:[#allocation12 + $0x68] sm:$0xff] }
  0xde   : > { %805 = vmatpush.bf16.msra.mxu1 %v2121_v20  ;;  %907 = vmatpush.msra.mxu2 %v902_v6 }
  0xdf   : > { %1052 = vmatpush.msra.mxu3 %v902_v6 }
  0xe1   : > { %605 = vmatpush.bf16.msra.mxu0 %v2111_v7  ;;  %v901_v7 = vld [vmem:[#allocation12 + $0x60] sm:$0xff] }
  0xe2   : > { %806 = vmatpush.bf16.msra.mxu1 %v2120_v21  ;;  %908 = vmatpush.msra.mxu2 %v901_v7  ;;  %v895_v21 = vld [vmem:[#allocation12 + $0x30] sm:$0xff] }
  0xe3   : > { %1053 = vmatpush.msra.mxu3 %v901_v7 }
  0xe4   : > { %606 = vmatmul.bf16.vlgmr.msra.gmra.mxu0 %v2095_v8 }
  0xe6   : > { %807 = vmatpush.bf16.msra.mxu1 %v2119_v22  ;;  %v894_v22 = vld [vmem:[#allocation12 + $0x28] sm:$0xff] }
  0xf4   : > { %611 = vmatmul.bf16.gmra.mxu0 %v2096_v9  ;;  %v900_v9 = vld [vmem:[#allocation12 + $0x58] sm:$0xff] }
  0xf5   : > { %909 = vmatpush.msra.mxu2 %v900_v9  ;;  %1054 = vmatpush.msra.mxu3 %v900_v9 }
 0x104   : > { %616 = vmatmul.bf16.gmra.mxu0 %v2097_v10 }
 0x114   : > { %621 = vmatmul.bf16.gmra.mxu0 %v2098_v11 }
 0x124   : > { %626 = vmatmul.bf16.gmra.mxu0 %v2099_v12  ;;  %v899_v12 = vld [vmem:[#allocation12 + $0x50] sm:$0xff] }
 0x125   : > { %910 = vmatpush.msra.mxu2 %v899_v12  ;;  %1055 = vmatpush.msra.mxu3 %v899_v12 }
 0x127   : > { %911 = vmatpush.msra.mxu2 %v898_v15  ;;  %1056 = vmatpush.msra.mxu3 %v898_v15 }
 0x129   : > { %912 = vmatpush.msra.mxu2 %v897_v16  ;;  %1057 = vmatpush.msra.mxu3 %v897_v16 }
 0x134   : > { %631 = vmatmul.bf16.gmra.mxu0 %v2100_v14 }
 0x144   : > { %636 = vmatmul.bf16.gmra.mxu0 %v2101_v19  ;;  %v896_v19 = vld [vmem:[#allocation12 + $0x38] sm:$0xff] }
 0x145   : > { %913 = vmatpush.msra.mxu2 %v896_v19  ;;  %1058 = vmatpush.msra.mxu3 %v896_v19 }
 0x147   : > { %914 = vmatpush.msra.mxu2 %v895_v21  ;;  %1059 = vmatpush.msra.mxu3 %v895_v21 }
 0x149   : > { %915 = vmatpush.msra.mxu2 %v894_v22  ;;  %1060 = vmatpush.msra.mxu3 %v894_v22 }
 0x154   : > { %641 = vmatmul.bf16.gmra.mxu0 %v2102_v23  ;;  %v893_v23 = vld [vmem:[#allocation12 + $0x20] sm:$0xff] }
 0x155   : > { %916 = vmatpush.msra.mxu2 %v893_v23  ;;  %1061 = vmatpush.msra.mxu3 %v893_v23 }
 0x161   : > { %v607_v26 = vpop.f32.mrf.mxu0 }
 0x162   : > { %v608_v28 = vadd.f32 %v607_v26, %v3126_v27  ;;  %v892_v26 = vld [vmem:[#allocation12 + $0x18] sm:$0xff] }
 0x163   : > { %917 = vmatpush.msra.mxu2 %v892_v26  ;;  %1062 = vmatpush.msra.mxu3 %v892_v26 }
 0x164   : > { %646 = vmatmul.bf16.gmra.mxu0 %v2103_v24  ;;  %v687_v31 = vmax.f32 %v608_v28, 0.0 }
 0x169   : > { %v609_v29 = vpop.f32.mrf.mxu0 }
 0x16a   : > { %v610_v30 = vadd.f32 %v609_v29, %v3126_v27 }
 0x16c   : > { %v688_v32 = vmax.f32 %v610_v30, 0.0  ;;  %v891_v30 = vld [vmem:[#allocation12 + $0x10] sm:$0xff] }
 0x16d   : > { %918 = vmatpush.msra.mxu2 %v891_v30  ;;  %1063 = vmatpush.msra.mxu3 %v891_v30 }
 0x16e   : > { %v719_v33 = vpack.c.bf16 %v688_v32, %v687_v31 }
 0x170   : > { %808 = vmatmul.bf16.vlgmr.msra.gmra.mxu1 %v719_v33  ;;  %v890_v33 = vld [vmem:[#allocation12 + $0x8] sm:$0xff] }
 0x171   : > { %v612_v35 = vpop.f32.mrf.mxu0  ;;  %919 = vmatpush.msra.mxu2 %v890_v33  ;;  %1064 = vmatpush.msra.mxu3 %v890_v33 }
 0x172   : > { %v613_v36 = vadd.f32 %v612_v35, %v3126_v27  ;;  %v889_v35 = vld [vmem:[#allocation12] sm:$0xff] }
 0x173   : > { %920 = vmatpush.msra.mxu2 %v889_v35  ;;  %1065 = vmatpush.msra.mxu3 %v889_v35 }
 0x174   : > { %651 = vmatmul.bf16.gmra.mxu0 %v2104_v34  ;;  %v689_v39 = vmax.f32 %v613_v36, 0.0  ;;  %v2110_v36 = vld [vmem:[%s3073_s14 + $0x78] sm:$0xff]  ;;  %s3813_s14 = sld [smem:[#allocation43_spill]] }
 0x179   : > { %v614_v37 = vpop.f32.mrf.mxu0 }
 0x17a   : > { %v615_v38 = vadd.f32 %v614_v37, %v3126_v27  ;;  %s1785_s18 = scalar_lea.hbm %s3813_s14, %s2127_s22  ;;  %s2537_s25 = scalar_lea.hbm %s3813_s14, 768 }
 0x17b   : > { %s1788_s17 = sshll.u32 %s1785_s18, 4  ;;  %s1789_s17 = int_to_ptr.hbm [resolvable:$true] %s1788_s17 }
 0x17c   : > { %v690_v40 = vmax.f32 %v615_v38, 0.0  ;;  %s2531_s9 = sshra.s32 %s1789_s17, 4  ;;  %s2532_s9 = int_to_ptr.hbm [resolvable:$true] %s2531_s9 }
 0x17d   : > { %s2533_s7 = scalar_lea.hbm %s2532_s9, 256  ;;  %p2538_p12 = scmp.lt.s32.totalorder %s2532_s9, %s3813_s14 }
 0x17e   : > { %v720_v41 = vpack.c.bf16 %v690_v40, %v689_v39  ;;  %p2534_p9 = scmp.ne.s32.totalorder %s2532_s9, %s2533_s7  ;;  %p2539_p2 = scmp.lt.s32.totalorder %s2537_s25, %s2533_s7 }
 0x180   : > { %813 = vmatmul.bf16.gmra.mxu1 %v720_v41  ;;  %p2535_p5 = pnand %p2534_p9, %p3815_p10  ;;  %p2540_p1 = por %p2539_p2, %p2538_p12 }
 0x181   : > { %v617_v43 = vpop.f32.mrf.mxu0 }
 0x182   : > { %v618_v44 = vadd.f32 %v617_v43, %v3126_v27  ;;  %p2536_p0 = pneg %p2535_p5 }
 0x184   : > { %656 = vmatmul.bf16.gmra.mxu0 %v2105_v42  ;;  %v691_v47 = vmax.f32 %v618_v44, 0.0  ;;  %p2541_p7 = pnand %p2540_p1, %p2536_p0 }
 0x189   : > { %v619_v45 = vpop.f32.mrf.mxu0 }
 0x18a   : > { %v620_v46 = vadd.f32 %v619_v45, %v3126_v27 }
 0x18c   : > { %v692_v48 = vmax.f32 %v620_v46, 0.0 }
 0x18e   : > { %v721_v49 = vpack.c.bf16 %v692_v48, %v691_v47  ;;  %v3154_v48 = vperm.slane %v3123_v25, 1 }
 0x190   : > { %818 = vmatmul.bf16.gmra.mxu1 %v721_v49 }
 0x191   : > { %v622_v51 = vpop.f32.mrf.mxu0 }
 0x192   : > { %v623_v52 = vadd.f32 %v622_v51, %v3126_v27 }
 0x194   : > { %661 = vmatmul.bf16.gmra.mxu0 %v2106_v50  ;;  %v693_v55 = vmax.f32 %v623_v52, 0.0 }
 0x199   : > { %v624_v53 = vpop.f32.mrf.mxu0 }
 0x19a   : > { %v625_v54 = vadd.f32 %v624_v53, %v3126_v27 }
 0x19c   : > { %v694_v56 = vmax.f32 %v625_v54, 0.0 }
 0x19e   : > { %v722_v57 = vpack.c.bf16 %v694_v56, %v693_v55 }
 0x1a0   : > { %823 = vmatmul.bf16.gmra.mxu1 %v722_v57 }
 0x1a1   : > { %v627_v59 = vpop.f32.mrf.mxu0 }
 0x1a2   : > { %v628_v60 = vadd.f32 %v627_v59, %v3126_v27 }
 0x1a4   : > { %666 = vmatmul.bf16.gmra.mxu0 %v2107_v58  ;;  %v695_v63 = vmax.f32 %v628_v60, 0.0 }
 0x1a9   : > { %v629_v61 = vpop.f32.mrf.mxu0 }
 0x1aa   : > { %v630_v62 = vadd.f32 %v629_v61, %v3126_v27 }
 0x1ac   : > { %v696_v0 = vmax.f32 %v630_v62, 0.0 }
 0x1ae   : > { %v723_v1 = vpack.c.bf16 %v696_v0, %v695_v63 }
 0x1b0   : > { %828 = vmatmul.bf16.gmra.mxu1 %v723_v1 }
 0x1b1   : > { %v632_v4 = vpop.f32.mrf.mxu0 }
 0x1b2   : > { %v633_v8 = vadd.f32 %v632_v4, %v3126_v27 }
 0x1b4   : > { %671 = vmatmul.bf16.gmra.mxu0 %v2108_v2  ;;  %v697_v13 = vmax.f32 %v633_v8, 0.0 }
 0x1b9   : > { %v634_v10 = vpop.f32.mrf.mxu0 }
 0x1ba   : > { %v635_v11 = vadd.f32 %v634_v10, %v3126_v27 }
 0x1bc   : > { %v698_v14 = vmax.f32 %v635_v11, 0.0 }
 0x1be   : > { %v724_v17 = vpack.c.bf16 %v698_v14, %v697_v13 }
 0x1c0   : > { %833 = vmatmul.bf16.gmra.mxu1 %v724_v17 }
 0x1c1   : > { %v637_v20 = vpop.f32.mrf.mxu0 }
 0x1c2   : > { %v638_v24 = vadd.f32 %v637_v20, %v3126_v27 }
 0x1c4   : > { %676 = vmatmul.bf16.gmra.mxu0 %v2109_v18  ;;  %v699_v31 = vmax.f32 %v638_v24, 0.0 }
 0x1c9   : > { %v639_v28 = vpop.f32.mrf.mxu0 }
 0x1ca   : > { %v640_v29 = vadd.f32 %v639_v28, %v3126_v27 }
 0x1cc   : > { %v700_v32 = vmax.f32 %v640_v29, 0.0 }
 0x1ce   : > { %v725_v34 = vpack.c.bf16 %v700_v32, %v699_v31 }
 0x1d0   : > { %838 = vmatmul.bf16.gmra.mxu1 %v725_v34 }
 0x1d1   : > { %v642_v37 = vpop.f32.mrf.mxu0 }
 0x1d2   : > { %v643_v38 = vadd.f32 %v642_v37, %v3126_v27 }
 0x1d4   : > { %681 = vmatmul.bf16.gmra.mxu0 %v2110_v36  ;;  %v701_v41 = vmax.f32 %v643_v38, 0.0 }
 0x1d9   : > { %v644_v39 = vpop.f32.mrf.mxu0 }
 0x1da   : > { %v645_v40 = vadd.f32 %v644_v39, %v3126_v27 }
 0x1dc   : > { %v702_v42 = vmax.f32 %v645_v40, 0.0 }
 0x1de   : > { %v726_v43 = vpack.c.bf16 %v702_v42, %v701_v41 }
 0x1e0   : > { %843 = vmatmul.bf16.gmra.mxu1 %v726_v43 }
 0x1e1   : > { %v647_v44 = vpop.f32.mrf.mxu0 }
 0x1e2   : > { %v648_v45 = vadd.f32 %v647_v44, %v3126_v27 }
 0x1e4   : > { %v703_v49 = vmax.f32 %v648_v45, 0.0 }
 0x1e9   : > { %v649_v46 = vpop.f32.mrf.mxu0 }
 0x1ea   : > { %v650_v47 = vadd.f32 %v649_v46, %v3126_v27 }
 0x1ec   : > { %v704_v50 = vmax.f32 %v650_v47, 0.0 }
 0x1ed   : > { %v809_v51 = vpop.f32.mrf.mxu1 }
 0x1ee   : > { %v3157_v52 = vadd.f32 %v809_v51, %v3154_v48  ;;  %v727_v53 = vpack.c.bf16 %v704_v50, %v703_v49 }
 0x1f0   : > { %848 = vmatmul.bf16.gmra.mxu1 %v727_v53  ;;  %921 = vmatmul.f32.vlgmr.msra.gmra.mxu2 %v3157_v52  ;;  %v1018_v54 = vmul.f32 %v3157_v52, %v3157_v52 }
 0x1f1   : > { %v652_v55 = vpop.f32.mrf.mxu0 }
 0x1f2   : > { %1066 = vmatmul.f32.vlgmr.msra.gmra.mxu3 %v1018_v54  ;;  %v653_v58 = vadd.f32 %v652_v55, %v3126_v27 }
 0x1f4   : > { %v705_v62 = vmax.f32 %v653_v58, 0.0 }
 0x1f5   : > { %v811_v56 = vpop.f32.mrf.mxu1 }
 0x1f6   : > { %v3163_v57 = vadd.f32 %v811_v56, %v3154_v48 }
 0x1f8   : > { %924 = vmatmul.f32.gmra.mxu2 %v3163_v57  ;;  %v1019_v59 = vmul.f32 %v3163_v57, %v3163_v57 }
 0x1f9   : > { %v654_v60 = vpop.f32.mrf.mxu0 }
 0x1fa   : > { %v655_v61 = vadd.f32 %v654_v60, %v3126_v27  ;;  %1069 = vmatmul.f32.gmra.mxu3 %v1019_v59 }
 0x1fc   : > { %v706_v63 = vmax.f32 %v655_v61, 0.0 }
 0x1fd   : > { %v814_v0 = vpop.f32.mrf.mxu1 }
 0x1fe   : > { %v3171_v1 = vadd.f32 %v814_v0, %v3154_v48  ;;  %v728_v2 = vpack.c.bf16 %v706_v63, %v705_v62 }
 0x200   : > { %853 = vmatmul.bf16.gmra.mxu1 %v728_v2  ;;  %927 = vmatmul.f32.gmra.mxu2 %v3171_v1  ;;  %v1020_v3 = vmul.f32 %v3171_v1, %v3171_v1 }
 0x201   : > { %v657_v4 = vpop.f32.mrf.mxu0 }
 0x202   : > { %1072 = vmatmul.f32.gmra.mxu3 %v1020_v3  ;;  %v658_v7 = vadd.f32 %v657_v4, %v3126_v27 }
 0x204   : > { %v707_v11 = vmax.f32 %v658_v7, 0.0 }
 0x205   : > { %v816_v5 = vpop.f32.mrf.mxu1 }
 0x206   : > { %v3177_v6 = vadd.f32 %v816_v5, %v3154_v48 }
 0x208   : > { %930 = vmatmul.f32.gmra.mxu2 %v3177_v6  ;;  %v1021_v8 = vmul.f32 %v3177_v6, %v3177_v6 }
 0x209   : > { %v659_v9 = vpop.f32.mrf.mxu0 }
 0x20a   : > { %v660_v10 = vadd.f32 %v659_v9, %v3126_v27  ;;  %1075 = vmatmul.f32.gmra.mxu3 %v1021_v8 }
 0x20c   : > { %v708_v12 = vmax.f32 %v660_v10, 0.0 }
 0x20d   : > { %v819_v13 = vpop.f32.mrf.mxu1 }
 0x20e   : > { %v3185_v14 = vadd.f32 %v819_v13, %v3154_v48  ;;  %v729_v15 = vpack.c.bf16 %v708_v12, %v707_v11 }
 0x210   : > { %858 = vmatmul.bf16.gmra.mxu1 %v729_v15  ;;  %933 = vmatmul.f32.gmra.mxu2 %v3185_v14  ;;  %v1022_v16 = vmul.f32 %v3185_v14, %v3185_v14 }
 0x211   : > { %v662_v17 = vpop.f32.mrf.mxu0 }
 0x212   : > { %1078 = vmatmul.f32.gmra.mxu3 %v1022_v16  ;;  %v663_v20 = vadd.f32 %v662_v17, %v3126_v27 }
 0x214   : > { %v709_v24 = vmax.f32 %v663_v20, 0.0 }
 0x215   : > { %v821_v18 = vpop.f32.mrf.mxu1 }
 0x216   : > { %v3191_v19 = vadd.f32 %v821_v18, %v3154_v48 }
 0x218   : > { %936 = vmatmul.f32.gmra.mxu2 %v3191_v19  ;;  %v1023_v21 = vmul.f32 %v3191_v19, %v3191_v19 }
 0x219   : > { %v664_v22 = vpop.f32.mrf.mxu0 }
 0x21a   : > { %v665_v23 = vadd.f32 %v664_v22, %v3126_v27  ;;  %1081 = vmatmul.f32.gmra.mxu3 %v1023_v21 }
 0x21c   : > { %v710_v26 = vmax.f32 %v665_v23, 0.0 }
 0x21d   : > { %v824_v28 = vpop.f32.mrf.mxu1 }
 0x21e   : > { %v3199_v29 = vadd.f32 %v824_v28, %v3154_v48  ;;  %v730_v30 = vpack.c.bf16 %v710_v26, %v709_v24 }
 0x220   : > { %863 = vmatmul.bf16.gmra.mxu1 %v730_v30  ;;  %939 = vmatmul.f32.gmra.mxu2 %v3199_v29  ;;  %v1024_v31 = vmul.f32 %v3199_v29, %v3199_v29 }
 0x221   : > { %v667_v32 = vpop.f32.mrf.mxu0 }
 0x222   : > { %1084 = vmatmul.f32.gmra.mxu3 %v1024_v31  ;;  %v668_v35 = vadd.f32 %v667_v32, %v3126_v27 }
 0x224   : > { %v711_v39 = vmax.f32 %v668_v35, 0.0 }
 0x225   : > { %v826_v33 = vpop.f32.mrf.mxu1 }
 0x226   : > { %v3205_v34 = vadd.f32 %v826_v33, %v3154_v48 }
 0x228   : > { %942 = vmatmul.f32.gmra.mxu2 %v3205_v34  ;;  %v1025_v36 = vmul.f32 %v3205_v34, %v3205_v34 }
 0x229   : > { %v669_v37 = vpop.f32.mrf.mxu0 }
 0x22a   : > { %v670_v38 = vadd.f32 %v669_v37, %v3126_v27  ;;  %1087 = vmatmul.f32.gmra.mxu3 %v1025_v36 }
 0x22c   : > { %v712_v40 = vmax.f32 %v670_v38, 0.0 }
 0x22d   : > { %v829_v41 = vpop.f32.mrf.mxu1 }
 0x22e   : > { %v731_v42 = vpack.c.bf16 %v712_v40, %v711_v39  ;;  %v3213_v43 = vadd.f32 %v829_v41, %v3154_v48 }
 0x230   : > { %868 = vmatmul.bf16.gmra.mxu1 %v731_v42  ;;  %945 = vmatmul.f32.gmra.mxu2 %v3213_v43  ;;  %v1026_v44 = vmul.f32 %v3213_v43, %v3213_v43 }
 0x231   : > { %v672_v45 = vpop.f32.mrf.mxu0 }
 0x232   : > { %1090 = vmatmul.f32.gmra.mxu3 %v1026_v44  ;;  %v673_v49 = vadd.f32 %v672_v45, %v3126_v27 }
 0x234   : > { %v713_v54 = vmax.f32 %v673_v49, 0.0 }
 0x235   : > { %v831_v46 = vpop.f32.mrf.mxu1 }
 0x236   : > { %v3219_v47 = vadd.f32 %v831_v46, %v3154_v48 }
 0x238   : > { %948 = vmatmul.f32.gmra.mxu2 %v3219_v47  ;;  %v1027_v50 = vmul.f32 %v3219_v47, %v3219_v47 }
 0x239   : > { %v674_v51 = vpop.f32.mrf.mxu0 }
 0x23a   : > { %v675_v53 = vadd.f32 %v674_v51, %v3126_v27  ;;  %1093 = vmatmul.f32.gmra.mxu3 %v1027_v50 }
 0x23c   : > { %v714_v55 = vmax.f32 %v675_v53, 0.0 }
 0x23d   : > { %v834_v56 = vpop.f32.mrf.mxu1 }
 0x23e   : > { %v732_v58 = vpack.c.bf16 %v714_v55, %v713_v54  ;;  %v3227_v59 = vadd.f32 %v834_v56, %v3154_v48 }
 0x240   : > { %873 = vmatmul.bf16.gmra.mxu1 %v732_v58  ;;  %951 = vmatmul.f32.gmra.mxu2 %v3227_v59  ;;  %v1028_v60 = vmul.f32 %v3227_v59, %v3227_v59 }
 0x241   : > { %v677_v61 = vpop.f32.mrf.mxu0 }
 0x242   : > { %1096 = vmatmul.f32.gmra.mxu3 %v1028_v60  ;;  %v678_v0 = vadd.f32 %v677_v61, %v3126_v27 }
 0x244   : > { %v715_v5 = vmax.f32 %v678_v0, 0.0 }
 0x245   : > { %v836_v62 = vpop.f32.mrf.mxu1 }
 0x246   : > { %v3233_v63 = vadd.f32 %v836_v62, %v3154_v48 }
 0x248   : > { %954 = vmatmul.f32.gmra.mxu2 %v3233_v63  ;;  %v1029_v2 = vmul.f32 %v3233_v63, %v3233_v63 }
 0x249   : > { %v679_v3 = vpop.f32.mrf.mxu0 }
 0x24a   : > { %v680_v4 = vadd.f32 %v679_v3, %v3126_v27  ;;  %1099 = vmatmul.f32.gmra.mxu3 %v1029_v2 }
 0x24c   : > { %v716_v7 = vmax.f32 %v680_v4, 0.0 }
 0x24d   : > { %v839_v8 = vpop.f32.mrf.mxu1 }
 0x24e   : > { %v733_v9 = vpack.c.bf16 %v716_v7, %v715_v5  ;;  %v3241_v10 = vadd.f32 %v839_v8, %v3154_v48 }
 0x250   : > { %878 = vmatmul.bf16.gmra.mxu1 %v733_v9  ;;  %957 = vmatmul.f32.gmra.mxu2 %v3241_v10  ;;  %v1030_v11 = vmul.f32 %v3241_v10, %v3241_v10 }
 0x251   : > { %v682_v12 = vpop.f32.mrf.mxu0 }
 0x252   : > { %1102 = vmatmul.f32.gmra.mxu3 %v1030_v11  ;;  %v683_v16 = vadd.f32 %v682_v12, %v3126_v27 }
 0x254   : > { %v717_v21 = vmax.f32 %v683_v16, 0.0 }
 0x255   : > { %v841_v13 = vpop.f32.mrf.mxu1 }
 0x256   : > { %v3247_v15 = vadd.f32 %v841_v13, %v3154_v48 }
 0x258   : > { %960 = vmatmul.f32.gmra.mxu2 %v3247_v15  ;;  %v1031_v17 = vmul.f32 %v3247_v15, %v3247_v15 }
 0x259   : > { %v684_v18 = vpop.f32.mrf.mxu0 }
 0x25a   : > { %v685_v20 = vadd.f32 %v684_v18, %v3126_v27  ;;  %1105 = vmatmul.f32.gmra.mxu3 %v1031_v17 }
 0x25c   : > { %v718_v22 = vmax.f32 %v685_v20, 0.0 }
 0x25d   : > { %v844_v23 = vpop.f32.mrf.mxu1 }
 0x25e   : > { %v734_v24 = vpack.c.bf16 %v718_v22, %v717_v21  ;;  %v3255_v26 = vadd.f32 %v844_v23, %v3154_v48  ;;  %v3303_v21 = vperm.slane %v3123_v25, 2 }
 0x260   : > { %883 = vmatmul.bf16.gmra.mxu1 %v734_v24  ;;  %963 = vmatmul.f32.gmra.mxu2 %v3255_v26  ;;  %v1032_v28 = vmul.f32 %v3255_v26, %v3255_v26 }
 0x262   : > { %1108 = vmatmul.f32.gmra.mxu3 %v1032_v28 }
 0x265   : > { %v846_v30 = vpop.f32.mrf.mxu1 }
 0x266   : > { %v3261_v31 = vadd.f32 %v846_v30, %v3154_v48 }
 0x268   : > { %966 = vmatmul.f32.gmra.mxu2 %v3261_v31  ;;  %v1033_v27 = vmul.f32 %v3261_v31, %v3261_v31 }
 0x26a   : > { %1111 = vmatmul.f32.gmra.mxu3 %v1033_v27 }
 0x26d   : > { %v849_v32 = vpop.f32.mrf.mxu1 }
 0x26e   : > { %v3267_v33 = vadd.f32 %v849_v32, %v3154_v48  ;;  %v3310_v32 = vperm.slane %v3123_v25, 3 }
 0x270   : > { %969 = vmatmul.f32.gmra.mxu2 %v3267_v33  ;;  %v1034_v35 = vmul.f32 %v3267_v33, %v3267_v33 }
 0x272   : > { %1114 = vmatmul.f32.gmra.mxu3 %v1034_v35 }
 0x273   : > { %v922_v36 = vpop.f32.mrf.mxu2 }
 0x274   : > { %v1163_v37 = vmul.f32 %v922_v36, %v922_v36  ;;  %v1259_v22 = vsub.f32 %v3157_v52, %v922_v36 }
 0x275   : > { %v851_v38 = vpop.f32.mrf.mxu1  ;;  %v1067_v39 = vpop.f32.mrf.mxu3 }
 0x276   : > { %v3273_v40 = vadd.f32 %v851_v38, %v3154_v48  ;;  %v1195_v41 = vsub.f32 %v1067_v39, %v1163_v37 }
 0x278   : > { %v1227_v42 = vmax.f32 %v1195_v41, 0.0  ;;  %972 = vmatmul.f32.gmra.mxu2 %v3273_v40  ;;  %v1035_v44 = vmul.f32 %v3273_v40, %v3273_v40 }
 0x27a   : > { %v1291_v45 = vadd.f32 1e-05, %v1227_v42  ;;  %1117 = vmatmul.f32.gmra.mxu3 %v1035_v44 }
 0x27b   : > { %v3278_v46 = vpop.f32.mrf.mxu2 }
 0x27c   : > { %2291 = vrsqrt.f32 %v1291_v45  ;;  %v1164_v49 = vmul.f32 %v3278_v46, %v3278_v46  ;;  %vm1329_vm1 = vweird.f32 %v1291_v45 }
 0x27d   : > { %v854_v50 = vpop.f32.mrf.mxu1  ;;  %v1070_v51 = vpop.f32.mrf.mxu3 }
 0x27e   : > { %v3283_v53 = vadd.f32 %v854_v50, %v3154_v48  ;;  %v1196_v54 = vsub.f32 %v1070_v51, %v1164_v49 }
 0x280   : > { %v1228_v55 = vmax.f32 %v1196_v54, 0.0  ;;  %975 = vmatmul.f32.gmra.mxu2 %v3283_v53  ;;  %v1036_v56 = vmul.f32 %v3283_v53, %v3283_v53  ;;  %v1260_v54 = vsub.f32 %v3163_v57, %v3278_v46 }
 0x282   : > { %v2292_v58 = vpop.eup %2291  ;;  %v1292_v60 = vadd.f32 1e-05, %v1228_v55  ;;  %1120 = vmatmul.f32.gmra.mxu3 %v1036_v56 }
 0x283   : > { %v1324_v61 = vmul.f32 %v2292_v58, %v1291_v45  ;;  %v3288_v62 = vpop.f32.mrf.mxu2  ;;  %vm1330_vm0 = vweird.f32 %v2292_v58 }
 0x284   : > { %2293 = vrsqrt.f32 %v1292_v60  ;;  %v1165_v0 = vmul.f32 %v3288_v62, %v3288_v62  ;;  %vm1331_vm2 = vmor %vm1329_vm1, %vm1330_vm0  ;;  %vm1339_vm4 = vweird.f32 %v1292_v60 }
 0x285   : > { %v1325_v2 = vmul.f32 %v2292_v58, %v1324_v61  ;;  %v856_v3 = vpop.f32.mrf.mxu1  ;;  %v1073_v4 = vpop.f32.mrf.mxu3 }
 0x286   : > { %v3293_v5 = vadd.f32 %v856_v3, %v3154_v48  ;;  %v1197_v7 = vsub.f32 %v1073_v4, %v1165_v0 }
 0x287   : > { %v1326_v8 = vmul.f32 0.5, %v1325_v2 }
 0x288   : > { %v1229_v9 = vmax.f32 %v1197_v7, 0.0  ;;  %978 = vmatmul.f32.gmra.mxu2 %v3293_v5  ;;  %v1037_v11 = vmul.f32 %v3293_v5, %v3293_v5 }
 0x289   : > { %v1327_v12 = vsub.f32 1.5, %v1326_v8 }
 0x28a   : > { %v2294_v13 = vpop.eup %2293  ;;  %v3298_v16 = vadd.f32 1e-05, %v1229_v9  ;;  %1123 = vmatmul.f32.gmra.mxu3 %v1037_v11 }
 0x28b   : > { %v1328_v17 = vmul.f32 %v2292_v58, %v1327_v12  ;;  %v1334_v18 = vmul.f32 %v2294_v13, %v1292_v60  ;;  %v3300_v20 = vpop.f32.mrf.mxu2  ;;  %vm1340_vm3 = vweird.f32 %v2294_v13 }
 0x28c   : > { %2295 = vrsqrt.f32 %v3298_v16  ;;  %v1166_v23 = vmul.f32 %v3300_v20, %v3300_v20  ;;  %vm1341_vm5 = vmor %vm1339_vm4, %vm1340_vm3  ;;  %vm1349_vm7 = vweird.f32 %v3298_v16 }
 0x28d   : > { %v1332_v24 = vsel %vm1331_vm2, %v2292_v58, %v1328_v17  ;;  %v1335_v28 = vmul.f32 %v2294_v13, %v1334_v18  ;;  %v859_v30 = vpop.f32.mrf.mxu1  ;;  %v1076_v27 = vpop.f32.mrf.mxu3 }
 0x28e   : > { %v1643_v35 = vmul.f32 %v1332_v24, %v1259_v22  ;;  %v3314_v37 = vadd.f32 %v859_v30, %v3154_v48  ;;  %v1198_v38 = vsub.f32 %v1076_v27, %v1166_v23  ;;  %v1261_v22 = vsub.f32 %v3171_v1, %v3288_v62 }
 0x28f   : > { %v1336_v52 = vmul.f32 0.5, %v1335_v28 }
 0x290   : > { %v1676_v36 = vmul.f32 %v3303_v21, %v1643_v35  ;;  %v1230_v39 = vmax.f32 %v1198_v38, 0.0  ;;  %981 = vmatmul.f32.gmra.mxu2 %v3314_v37  ;;  %v1038_v41 = vmul.f32 %v3314_v37, %v3314_v37 }
 0x291   : > { %v1337_v42 = vsub.f32 1.5, %v1336_v52 }
 0x292   : > { %v2296_v44 = vpop.eup %2295  ;;  %v1709_v25 = vadd.f32 %v3310_v32, %v1676_v36  ;;  %v3321_v45 = vadd.f32 1e-05, %v1230_v39  ;;  %1126 = vmatmul.f32.gmra.mxu3 %v1038_v41 }
 0x293   : > { %v1338_v49 = vmul.f32 %v2294_v13, %v1337_v42  ;;  %v1344_v50 = vmul.f32 %v2296_v44, %v3298_v16  ;;  %v3324_v51 = vpop.f32.mrf.mxu2  ;;  %vm1350_vm6 = vweird.f32 %v2296_v44 }
 0x294   : > { %1741 = vst [vmem:[%s3326_s1] sm:$0xff] %v1709_v25  ;;  %2297 = vrsqrt.f32 %v3321_v45  ;;  %v1167_v55 = vmul.f32 %v3324_v51, %v3324_v51  ;;  %vm1351_vm8 = vmor %vm1349_vm7, %vm1350_vm6  ;;  %vm1359_vm10 = vweird.f32 %v3321_v45 }
 0x295   : > { %v1342_v56 = vsel %vm1341_vm5, %v2294_v13, %v1338_v49  ;;  %v1345_v58 = vmul.f32 %v2296_v44, %v1344_v50  ;;  %v861_v60 = vpop.f32.mrf.mxu1  ;;  %v1079_v61 = vpop.f32.mrf.mxu3 }
 0x296   : > { %v1644_v0 = vmul.f32 %v1342_v56, %v1260_v54  ;;  %v3335_v2 = vadd.f32 %v861_v60, %v3154_v48  ;;  %v1199_v3 = vsub.f32 %v1079_v61, %v1167_v55  ;;  %v1262_v54 = vsub.f32 %v3177_v6, %v3300_v20 }
 0x297   : > { %v1346_v4 = vmul.f32 0.5, %v1345_v58 }
 0x298   : > { %v1677_v7 = vmul.f32 %v3303_v21, %v1644_v0  ;;  %v1231_v57 = vmax.f32 %v1199_v3, 0.0  ;;  %984 = vmatmul.f32.gmra.mxu2 %v3335_v2  ;;  %v1039_v46 = vmul.f32 %v3335_v2, %v3335_v2 }
 0x299   : > { %v1347_v8 = vsub.f32 1.5, %v1346_v4 }
 0x29a   : > { %v2298_v9 = vpop.eup %2297  ;;  %v1710_v11 = vadd.f32 %v3310_v32, %v1677_v7  ;;  %v1295_v12 = vadd.f32 1e-05, %v1231_v57  ;;  %1129 = vmatmul.f32.gmra.mxu3 %v1039_v46 }
 0x29b   : > { %v1348_v13 = vmul.f32 %v2296_v44, %v1347_v8  ;;  %v1354_v17 = vmul.f32 %v2298_v9, %v3321_v45  ;;  %v3344_v18 = vpop.f32.mrf.mxu2  ;;  %vm1360_vm9 = vweird.f32 %v2298_v9 }
 0x29c   : > { %1742 = vst [vmem:[%s3326_s1 + $0x8] sm:$0xff] %v1710_v11  ;;  %2299 = vrsqrt.f32 %v1295_v12  ;;  %v1168_v23 = vmul.f32 %v3344_v18, %v3344_v18  ;;  %vm1361_vm11 = vmor %vm1359_vm10, %vm1360_vm9  ;;  %vm1369_vm13 = vweird.f32 %v1295_v12 }
 0x29d   : > { %v1352_v24 = vsel %vm1351_vm8, %v2296_v44, %v1348_v13  ;;  %v1355_v28 = vmul.f32 %v2298_v9, %v1354_v17  ;;  %v864_v30 = vpop.f32.mrf.mxu1  ;;  %v1082_v27 = vpop.f32.mrf.mxu3 }
 0x29e   : > { %v1645_v35 = vmul.f32 %v1352_v24, %v1261_v22  ;;  %v3352_v16 = vadd.f32 %v864_v30, %v3154_v48  ;;  %v1200_v38 = vsub.f32 %v1082_v27, %v1168_v23  ;;  %v1263_v22 = vsub.f32 %v3185_v14, %v3324_v51 }
 0x29f   : > { %v1356_v52 = vmul.f32 0.5, %v1355_v28 }
 0x2a0   : > { %v1678_v36 = vmul.f32 %v3303_v21, %v1645_v35  ;;  %v1232_v39 = vmax.f32 %v1200_v38, 0.0  ;;  %987 = vmatmul.f32.gmra.mxu2 %v3352_v16  ;;  %v1040_v1 = vmul.f32 %v3352_v16, %v3352_v16 }
 0x2a1   : > { %v1357_v62 = vsub.f32 1.5, %v1356_v52 }
 0x2a2   : > { %v2300_v41 = vpop.eup %2299  ;;  %v1711_v42 = vadd.f32 %v3310_v32, %v1678_v36  ;;  %v1296_v44 = vadd.f32 1e-05, %v1232_v39  ;;  %1132 = vmatmul.f32.gmra.mxu3 %v1040_v1 }
 0x2a3   : > { %v1358_v25 = vmul.f32 %v2298_v9, %v1357_v62  ;;  %v1364_v49 = vmul.f32 %v2300_v41, %v1295_v12  ;;  %v3360_v50 = vpop.f32.mrf.mxu2  ;;  %vm1370_vm12 = vweird.f32 %v2300_v41 }
 0x2a4   : > { %1743 = vst [vmem:[%s3326_s1 + $0x10] sm:$0xff] %v1711_v42  ;;  %2301 = vrsqrt.f32 %v1296_v44  ;;  %v1169_v55 = vmul.f32 %v3360_v50, %v3360_v50  ;;  %vm1371_vm14 = vmor %vm1369_vm13, %vm1370_vm12  ;;  %vm1379_vm0 = vweird.f32 %v1296_v44 }
 0x2a5   : > { %v1362_v56 = vsel %vm1361_vm11, %v2298_v9, %v1358_v25  ;;  %v1365_v58 = vmul.f32 %v2300_v41, %v1364_v49  ;;  %v866_v60 = vpop.f32.mrf.mxu1  ;;  %v1085_v61 = vpop.f32.mrf.mxu3 }
 0x2a6   : > { %v1646_v0 = vmul.f32 %v1362_v56, %v1262_v54  ;;  %v3368_v3 = vadd.f32 %v866_v60, %v3154_v48  ;;  %v1201_v45 = vsub.f32 %v1085_v61, %v1169_v55  ;;  %v1264_v54 = vsub.f32 %v3191_v19, %v3344_v18 }
 0x2a7   : > { %v1366_v4 = vmul.f32 0.5, %v1365_v58 }
 0x2a8   : > { %v1679_v7 = vmul.f32 %v3303_v21, %v1646_v0  ;;  %v1233_v57 = vmax.f32 %v1201_v45, 0.0  ;;  %990 = vmatmul.f32.gmra.mxu2 %v3368_v3  ;;  %v1041_v6 = vmul.f32 %v3368_v3, %v3368_v3 }
 0x2a9   : > { %v1367_v20 = vsub.f32 1.5, %v1366_v4 }
 0x2aa   : > { %v2302_v46 = vpop.eup %2301  ;;  %v1712_v8 = vadd.f32 %v3310_v32, %v1679_v7  ;;  %v1297_v9 = vadd.f32 1e-05, %v1233_v57  ;;  %1135 = vmatmul.f32.gmra.mxu3 %v1041_v6 }
 0x2ab   : > { %v1368_v11 = vmul.f32 %v2300_v41, %v1367_v20  ;;  %v1374_v13 = vmul.f32 %v2302_v46, %v1296_v44  ;;  %v3375_v17 = vpop.f32.mrf.mxu2  ;;  %vm1380_vm15 = vweird.f32 %v2302_v46 }
 0x2ac   : > { %1744 = vst [vmem:[%s3326_s1 + $0x18] sm:$0xff] %v1712_v8  ;;  %2303 = vrsqrt.f32 %v1297_v9  ;;  %v1170_v23 = vmul.f32 %v3375_v17, %v3375_v17  ;;  %vm1381_vm1 = vmor %vm1379_vm0, %vm1380_vm15  ;;  %vm1389_vm3 = vweird.f32 %v1297_v9 }
 0x2ad   : > { %v1372_v24 = vsel %vm1371_vm14, %v2300_v41, %v1368_v11  ;;  %v1375_v28 = vmul.f32 %v2302_v46, %v1374_v13  ;;  %v869_v30 = vpop.f32.mrf.mxu1  ;;  %v1088_v27 = vpop.f32.mrf.mxu3 }
 0x2ae   : > { %v1647_v35 = vmul.f32 %v1372_v24, %v1263_v22  ;;  %v3383_v38 = vadd.f32 %v869_v30, %v3154_v48  ;;  %v1202_v12 = vsub.f32 %v1088_v27, %v1170_v23  ;;  %v1265_v22 = vsub.f32 %v3199_v29, %v3360_v50 }
 0x2af   : > { %v1376_v52 = vmul.f32 0.5, %v1375_v28 }
 0x2b0   : > { %v1680_v36 = vmul.f32 %v3303_v21, %v1647_v35  ;;  %v1234_v39 = vmax.f32 %v1202_v12, 0.0  ;;  %993 = vmatmul.f32.gmra.mxu2 %v3383_v38  ;;  %v1042_v14 = vmul.f32 %v3383_v38, %v3383_v38 }
 0x2b1   : > { %v1377_v51 = vsub.f32 1.5, %v1376_v52 }
 0x2b2   : > { %v2304_v1 = vpop.eup %2303  ;;  %v1713_v62 = vadd.f32 %v3310_v32, %v1680_v36  ;;  %v1298_v41 = vadd.f32 1e-05, %v1234_v39  ;;  %1138 = vmatmul.f32.gmra.mxu3 %v1042_v14 }
 0x2b3   : > { %v1378_v42 = vmul.f32 %v2302_v46, %v1377_v51  ;;  %v1384_v25 = vmul.f32 %v2304_v1, %v1297_v9  ;;  %v3390_v49 = vpop.f32.mrf.mxu2  ;;  %vm1390_vm2 = vweird.f32 %v2304_v1 }
 0x2b4   : > { %1745 = vst [vmem:[%s3326_s1 + $0x20] sm:$0xff] %v1713_v62  ;;  %2305 = vrsqrt.f32 %v1298_v41  ;;  %v1171_v55 = vmul.f32 %v3390_v49, %v3390_v49  ;;  %vm1391_vm4 = vmor %vm1389_vm3, %vm1390_vm2  ;;  %vm1399_vm6 = vweird.f32 %v1298_v41 }
 0x2b5   : > { %v1382_v56 = vsel %vm1381_vm1, %v2302_v46, %v1378_v42  ;;  %v1385_v58 = vmul.f32 %v2304_v1, %v1384_v25  ;;  %v871_v60 = vpop.f32.mrf.mxu1  ;;  %v1091_v61 = vpop.f32.mrf.mxu3 }
 0x2b6   : > { %v1648_v0 = vmul.f32 %v1382_v56, %v1264_v54  ;;  %v3398_v45 = vadd.f32 %v871_v60, %v3154_v48  ;;  %v1203_v44 = vsub.f32 %v1091_v61, %v1171_v55  ;;  %v1266_v54 = vsub.f32 %v3205_v34, %v3375_v17 }
 0x2b7   : > { %v1386_v4 = vmul.f32 0.5, %v1385_v58 }
 0x2b8   : > { %v1681_v7 = vmul.f32 %v3303_v21, %v1648_v0  ;;  %v1235_v57 = vmax.f32 %v1203_v44, 0.0  ;;  %996 = vmatmul.f32.gmra.mxu2 %v3398_v45  ;;  %v1043_v19 = vmul.f32 %v3398_v45, %v3398_v45 }
 0x2b9   : > { %v1387_v18 = vsub.f32 1.5, %v1386_v4 }
 0x2ba   : > { %v2306_v6 = vpop.eup %2305  ;;  %v1714_v20 = vadd.f32 %v3310_v32, %v1681_v7  ;;  %v1299_v46 = vadd.f32 1e-05, %v1235_v57  ;;  %1141 = vmatmul.f32.gmra.mxu3 %v1043_v19 }
 0x2bb   : > { %v1388_v8 = vmul.f32 %v2304_v1, %v1387_v18  ;;  %v1394_v11 = vmul.f32 %v2306_v6, %v1298_v41  ;;  %v3405_v13 = vpop.f32.mrf.mxu2  ;;  %vm1400_vm5 = vweird.f32 %v2306_v6 }
 0x2bc   : > { %1746 = vst [vmem:[%s3326_s1 + $0x28] sm:$0xff] %v1714_v20  ;;  %2307 = vrsqrt.f32 %v1299_v46  ;;  %v1172_v23 = vmul.f32 %v3405_v13, %v3405_v13  ;;  %vm1401_vm7 = vmor %vm1399_vm6, %vm1400_vm5  ;;  %vm1409_vm9 = vweird.f32 %v1299_v46 }
 0x2bd   : > { %v1392_v24 = vsel %vm1391_vm4, %v2304_v1, %v1388_v8  ;;  %v1395_v28 = vmul.f32 %v2306_v6, %v1394_v11  ;;  %v874_v30 = vpop.f32.mrf.mxu1  ;;  %v1094_v27 = vpop.f32.mrf.mxu3 }
 0x2be   : > { %v1649_v35 = vmul.f32 %v1392_v24, %v1265_v22  ;;  %v3413_v12 = vadd.f32 %v874_v30, %v3154_v48  ;;  %v1204_v9 = vsub.f32 %v1094_v27, %v1172_v23  ;;  %v1267_v22 = vsub.f32 %v3213_v43, %v3390_v49 }
 0x2bf   : > { %v1396_v52 = vmul.f32 0.5, %v1395_v28 }
 0x2c0   : > { %v1682_v36 = vmul.f32 %v3303_v21, %v1649_v35  ;;  %v1236_v39 = vmax.f32 %v1204_v9, 0.0  ;;  %999 = vmatmul.f32.gmra.mxu2 %v3413_v12  ;;  %v1044_v29 = vmul.f32 %v3413_v12, %v3413_v12 }
 0x2c1   : > { %v1397_v50 = vsub.f32 1.5, %v1396_v52 }
 0x2c2   : > { %v2308_v14 = vpop.eup %2307  ;;  %v1715_v51 = vadd.f32 %v3310_v32, %v1682_v36  ;;  %v1300_v1 = vadd.f32 1e-05, %v1236_v39  ;;  %1144 = vmatmul.f32.gmra.mxu3 %v1044_v29 }
 0x2c3   : > { %v1398_v62 = vmul.f32 %v2306_v6, %v1397_v50  ;;  %v1404_v42 = vmul.f32 %v2308_v14, %v1299_v46  ;;  %v3420_v25 = vpop.f32.mrf.mxu2  ;;  %vm1410_vm8 = vweird.f32 %v2308_v14 }
 0x2c4   : > { %1747 = vst [vmem:[%s3326_s1 + $0x30] sm:$0xff] %v1715_v51  ;;  %2309 = vrsqrt.f32 %v1300_v1  ;;  %v1173_v55 = vmul.f32 %v3420_v25, %v3420_v25  ;;  %vm1411_vm10 = vmor %vm1409_vm9, %vm1410_vm8  ;;  %vm1419_vm12 = vweird.f32 %v1300_v1 }
 0x2c5   : > { %v1402_v56 = vsel %vm1401_vm7, %v2306_v6, %v1398_v62  ;;  %v1405_v58 = vmul.f32 %v2308_v14, %v1404_v42  ;;  %v876_v60 = vpop.f32.mrf.mxu1  ;;  %v1097_v61 = vpop.f32.mrf.mxu3 }
 0x2c6   : > { %v1650_v0 = vmul.f32 %v1402_v56, %v1266_v54  ;;  %v3428_v44 = vadd.f32 %v876_v60, %v3154_v48  ;;  %v1205_v41 = vsub.f32 %v1097_v61, %v1173_v55  ;;  %v1268_v54 = vsub.f32 %v3219_v47, %v3405_v13 }
 0x2c7   : > { %v1406_v4 = vmul.f32 0.5, %v1405_v58 }
 0x2c8   : > { %v1683_v7 = vmul.f32 %v3303_v21, %v1650_v0  ;;  %v1237_v57 = vmax.f32 %v1205_v41, 0.0  ;;  %1002 = vmatmul.f32.gmra.mxu2 %v3428_v44  ;;  %v1045_v34 = vmul.f32 %v3428_v44, %v3428_v44 }
 0x2c9   : > { %v1407_v17 = vsub.f32 1.5, %v1406_v4 }
 0x2ca   : > { %v2310_v19 = vpop.eup %2309  ;;  %v1716_v18 = vadd.f32 %v3310_v32, %v1683_v7  ;;  %v1301_v6 = vadd.f32 1e-05, %v1237_v57  ;;  %1147 = vmatmul.f32.gmra.mxu3 %v1045_v34 }
 0x2cb   : > { %v1408_v20 = vmul.f32 %v2308_v14, %v1407_v17  ;;  %v1414_v8 = vmul.f32 %v2310_v19, %v1300_v1  ;;  %v3435_v11 = vpop.f32.mrf.mxu2  ;;  %vm1420_vm11 = vweird.f32 %v2310_v19 }
 0x2cc   : > { %1748 = vst [vmem:[%s3326_s1 + $0x38] sm:$0xff] %v1716_v18  ;;  %2311 = vrsqrt.f32 %v1301_v6  ;;  %v1174_v23 = vmul.f32 %v3435_v11, %v3435_v11  ;;  %vm1421_vm13 = vmor %vm1419_vm12, %vm1420_vm11  ;;  %vm1429_vm15 = vweird.f32 %v1301_v6 }
 0x2cd   : > { %v1412_v24 = vsel %vm1411_vm10, %v2308_v14, %v1408_v20  ;;  %v1415_v28 = vmul.f32 %v2310_v19, %v1414_v8  ;;  %v879_v30 = vpop.f32.mrf.mxu1  ;;  %v1100_v27 = vpop.f32.mrf.mxu3 }
 0x2ce   : > { %v1651_v35 = vmul.f32 %v1412_v24, %v1267_v22  ;;  %v3443_v9 = vadd.f32 %v879_v30, %v3154_v48  ;;  %v1206_v46 = vsub.f32 %v1100_v27, %v1174_v23  ;;  %v1269_v22 = vsub.f32 %v3227_v59, %v3420_v25 }
 0x2cf   : > { %v1416_v52 = vmul.f32 0.5, %v1415_v28 }
 0x2d0   : > { %v1684_v36 = vmul.f32 %v3303_v21, %v1651_v35  ;;  %v1238_v39 = vmax.f32 %v1206_v46, 0.0  ;;  %1005 = vmatmul.f32.gmra.mxu2 %v3443_v9  ;;  %v1046_v43 = vmul.f32 %v3443_v9, %v3443_v9 }
 0x2d1   : > { %v1417_v49 = vsub.f32 1.5, %v1416_v52 }
 0x2d2   : > { %v2312_v29 = vpop.eup %2311  ;;  %v1717_v50 = vadd.f32 %v3310_v32, %v1684_v36  ;;  %v1302_v14 = vadd.f32 1e-05, %v1238_v39  ;;  %1150 = vmatmul.f32.gmra.mxu3 %v1046_v43 }
 0x2d3   : > { %v1418_v51 = vmul.f32 %v2310_v19, %v1417_v49  ;;  %v1424_v62 = vmul.f32 %v2312_v29, %v1301_v6  ;;  %v3450_v42 = vpop.f32.mrf.mxu2  ;;  %vm1430_vm14 = vweird.f32 %v2312_v29 }
 0x2d4   : > { %1749 = vst [vmem:[%s3326_s1 + $0x40] sm:$0xff] %v1717_v50  ;;  %2313 = vrsqrt.f32 %v1302_v14  ;;  %v1175_v55 = vmul.f32 %v3450_v42, %v3450_v42  ;;  %vm1431_vm0 = vmor %vm1429_vm15, %vm1430_vm14  ;;  %vm1439_vm2 = vweird.f32 %v1302_v14 }
 0x2d5   : > { %v1422_v56 = vsel %vm1421_vm13, %v2310_v19, %v1418_v51  ;;  %v1425_v58 = vmul.f32 %v2312_v29, %v1424_v62  ;;  %v881_v60 = vpop.f32.mrf.mxu1  ;;  %v1103_v61 = vpop.f32.mrf.mxu3 }
 0x2d6   : > { %v1652_v0 = vmul.f32 %v1422_v56, %v1268_v54  ;;  %v3458_v41 = vadd.f32 %v881_v60, %v3154_v48  ;;  %v1207_v1 = vsub.f32 %v1103_v61, %v1175_v55  ;;  %v1270_v54 = vsub.f32 %v3233_v63, %v3435_v11 }
 0x2d7   : > { %v1426_v4 = vmul.f32 0.5, %v1425_v58 }
 0x2d8   : > { %v1685_v7 = vmul.f32 %v3303_v21, %v1652_v0  ;;  %v1239_v57 = vmax.f32 %v1207_v1, 0.0  ;;  %1008 = vmatmul.f32.gmra.mxu2 %v3458_v41  ;;  %v1047_v47 = vmul.f32 %v3458_v41, %v3458_v41 }
 0x2d9   : > { %v1427_v13 = vsub.f32 1.5, %v1426_v4 }
 0x2da   : > { %v2314_v34 = vpop.eup %2313  ;;  %v1718_v17 = vadd.f32 %v3310_v32, %v1685_v7  ;;  %v1303_v19 = vadd.f32 1e-05, %v1239_v57  ;;  %1153 = vmatmul.f32.gmra.mxu3 %v1047_v47 }
 0x2db   : > { %v1428_v18 = vmul.f32 %v2312_v29, %v1427_v13  ;;  %v1434_v20 = vmul.f32 %v2314_v34, %v1302_v14  ;;  %v3465_v8 = vpop.f32.mrf.mxu2  ;;  %vm1440_vm1 = vweird.f32 %v2314_v34 }
 0x2dc   : > { %1750 = vst [vmem:[%s3326_s1 + $0x48] sm:$0xff] %v1718_v17  ;;  %2315 = vrsqrt.f32 %v1303_v19  ;;  %v1176_v23 = vmul.f32 %v3465_v8, %v3465_v8  ;;  %vm1441_vm3 = vmor %vm1439_vm2, %vm1440_vm1  ;;  %vm1449_vm5 = vweird.f32 %v1303_v19 }
 0x2dd   : > { %v1432_v24 = vsel %vm1431_vm0, %v2312_v29, %v1428_v18  ;;  %v1435_v28 = vmul.f32 %v2314_v34, %v1434_v20  ;;  %v884_v30 = vpop.f32.mrf.mxu1  ;;  %v1106_v27 = vpop.f32.mrf.mxu3  ;;  %v1271_v20 = vsub.f32 %v3241_v10, %v3450_v42 }
 0x2de   : > { %v1653_v35 = vmul.f32 %v1432_v24, %v1269_v22  ;;  %v3473_v46 = vadd.f32 %v884_v30, %v3154_v48  ;;  %v1208_v6 = vsub.f32 %v1106_v27, %v1176_v23 }
 0x2df   : > { %v1436_v52 = vmul.f32 0.5, %v1435_v28 }
 0x2e0   : > { %v1686_v36 = vmul.f32 %v3303_v21, %v1653_v35  ;;  %v1240_v39 = vmax.f32 %v1208_v6, 0.0  ;;  %1011 = vmatmul.f32.gmra.mxu2 %v3473_v46  ;;  %v1048_v59 = vmul.f32 %v3473_v46, %v3473_v46 }
 0x2e1   : > { %v1437_v25 = vsub.f32 1.5, %v1436_v52 }
 0x2e2   : > { %v2316_v43 = vpop.eup %2315  ;;  %v1719_v49 = vadd.f32 %v3310_v32, %v1686_v36  ;;  %v1304_v29 = vadd.f32 1e-05, %v1240_v39  ;;  %1156 = vmatmul.f32.gmra.mxu3 %v1048_v59 }
 0x2e3   : > { %v1438_v50 = vmul.f32 %v2314_v34, %v1437_v25  ;;  %v1444_v51 = vmul.f32 %v2316_v43, %v1303_v19  ;;  %v3480_v62 = vpop.f32.mrf.mxu2  ;;  %vm1450_vm4 = vweird.f32 %v2316_v43 }
 0x2e4   : > { %1751 = vst [vmem:[%s3326_s1 + $0x50] sm:$0xff] %v1719_v49  ;;  %2317 = vrsqrt.f32 %v1304_v29  ;;  %v1177_v55 = vmul.f32 %v3480_v62, %v3480_v62  ;;  %vm1451_vm6 = vmor %vm1449_vm5, %vm1450_vm4  ;;  %vm1459_vm8 = vweird.f32 %v1304_v29 }
 0x2e5   : > { %v1442_v56 = vsel %vm1441_vm3, %v2314_v34, %v1438_v50  ;;  %v1445_v58 = vmul.f32 %v2316_v43, %v1444_v51  ;;  %v886_v60 = vpop.f32.mrf.mxu1  ;;  %v1109_v61 = vpop.f32.mrf.mxu3 }
 0x2e6   : > { %v1654_v0 = vmul.f32 %v1442_v56, %v1270_v54  ;;  %v3488_v1 = vadd.f32 %v886_v60, %v3154_v48  ;;  %v1209_v14 = vsub.f32 %v1109_v61, %v1177_v55 }
 0x2e7   : > { %v1446_v4 = vmul.f32 0.5, %v1445_v58 }
 0x2e8   : > { %v1687_v7 = vmul.f32 %v3303_v21, %v1654_v0  ;;  %v1241_v57 = vmax.f32 %v1209_v14, 0.0  ;;  %1014 = vmatmul.f32.gmra.mxu2 %v3488_v1  ;;  %v1049_v63 = vmul.f32 %v3488_v1, %v3488_v1 }
 0x2e9   : > { %v1447_v11 = vsub.f32 1.5, %v1446_v4 }
 0x2ea   : > { %v2318_v47 = vpop.eup %2317  ;;  %v1720_v13 = vadd.f32 %v3310_v32, %v1687_v7  ;;  %v1305_v34 = vadd.f32 1e-05, %v1241_v57  ;;  %1159 = vmatmul.f32.gmra.mxu3 %v1049_v63  ;;  %v1273_v57 = vsub.f32 %v3255_v26, %v3480_v62 }
 0x2eb   : > { %v1448_v48 = vmul.f32 %v2316_v43, %v1447_v11  ;;  %v1454_v17 = vmul.f32 %v2318_v47, %v1304_v29  ;;  %v3495_v18 = vpop.f32.mrf.mxu2  ;;  %vm1460_vm7 = vweird.f32 %v2318_v47 }
 0x2ec   : > { %1752 = vst [vmem:[%s3326_s1 + $0x58] sm:$0xff] %v1720_v13  ;;  %2319 = vrsqrt.f32 %v1305_v34  ;;  %v1178_v22 = vmul.f32 %v3495_v18, %v3495_v18  ;;  %vm1461_vm9 = vmor %vm1459_vm8, %vm1460_vm7  ;;  %vm1469_vm11 = vweird.f32 %v1305_v34 }
 0x2ed   : > { %v1452_v23 = vsel %vm1451_vm6, %v2316_v43, %v1448_v48  ;;  %v1455_v24 = vmul.f32 %v2318_v47, %v1454_v17  ;;  %v1112_v28 = vpop.f32.mrf.mxu3  ;;  %v1272_v43 = vsub.f32 %v3247_v15, %v3465_v8 }
 0x2ee   : > { %v1655_v30 = vmul.f32 %v1452_v23, %v1271_v20  ;;  %v1210_v27 = vsub.f32 %v1112_v28, %v1178_v22 }
 0x2ef   : > { %v1456_v35 = vmul.f32 0.5, %v1455_v24 }
 0x2f0   : > { %v1688_v19 = vmul.f32 %v3303_v21, %v1655_v30  ;;  %v1242_v6 = vmax.f32 %v1210_v27, 0.0 }
 0x2f1   : > { %v1457_v52 = vsub.f32 1.5, %v1456_v35  ;;  %v1274_v35 = vsub.f32 %v3261_v31, %v3495_v18 }
 0x2f2   : > { %v2320_v36 = vpop.eup %2319  ;;  %v1721_v10 = vadd.f32 %v3310_v32, %v1688_v19  ;;  %v1306_v42 = vadd.f32 1e-05, %v1242_v6 }
 0x2f3   : > { %v1458_v39 = vmul.f32 %v2318_v47, %v1457_v52  ;;  %v1464_v59 = vmul.f32 %v2320_v36, %v1305_v34  ;;  %v3504_v25 = vpop.f32.mrf.mxu2  ;;  %vm1470_vm10 = vweird.f32 %v2320_v36 }
 0x2f4   : > { %1753 = vst [vmem:[%s3326_s1 + $0x60] sm:$0xff] %v1721_v10  ;;  %2321 = vrsqrt.f32 %v1306_v42  ;;  %v1179_v49 = vmul.f32 %v3504_v25, %v3504_v25  ;;  %vm1471_vm12 = vmor %vm1469_vm11, %vm1470_vm10  ;;  %vm1479_vm14 = vweird.f32 %v1306_v42 }
 0x2f5   : > { %v1462_v50 = vsel %vm1461_vm9, %v2318_v47, %v1458_v39  ;;  %v1465_v51 = vmul.f32 %v2320_v36, %v1464_v59  ;;  %v1115_v54 = vpop.f32.mrf.mxu3 }
 0x2f6   : > { %v1656_v55 = vmul.f32 %v1462_v50, %v1272_v43  ;;  %v1211_v56 = vsub.f32 %v1115_v54, %v1179_v49 }
 0x2f7   : > { %v1466_v58 = vmul.f32 0.5, %v1465_v51 }
 0x2f8   : > { %v1689_v29 = vmul.f32 %v3303_v21, %v1656_v55  ;;  %v1243_v60 = vmax.f32 %v1211_v56, 0.0  ;;  %v1275_v56 = vsub.f32 %v3267_v33, %v3504_v25 }
 0x2f9   : > { %v1467_v61 = vsub.f32 1.5, %v1466_v58 }
 0x2fa   : > { %v2322_v0 = vpop.eup %2321  ;;  %v1722_v15 = vadd.f32 %v3310_v32, %v1689_v29  ;;  %v1307_v8 = vadd.f32 1e-05, %v1243_v60 }
 0x2fb   : > { %v1468_v14 = vmul.f32 %v2320_v36, %v1467_v61  ;;  %v1474_v4 = vmul.f32 %v2322_v0, %v1306_v42  ;;  %v3513_v7 = vpop.f32.mrf.mxu2  ;;  %vm1480_vm13 = vweird.f32 %v2322_v0 }
 0x2fc   : > { %1754 = vst [vmem:[%s3326_s1 + $0x68] sm:$0xff] %v1722_v15  ;;  %2323 = vrsqrt.f32 %v1307_v8  ;;  %v1180_v63 = vmul.f32 %v3513_v7, %v3513_v7  ;;  %vm1481_vm15 = vmor %vm1479_vm14, %vm1480_vm13  ;;  %vm1489_vm1 = vweird.f32 %v1307_v8 }
 0x2fd   : > { %v1472_v11 = vsel %vm1471_vm12, %v2320_v36, %v1468_v14  ;;  %v1475_v47 = vmul.f32 %v2322_v0, %v1474_v4  ;;  %v1118_v13 = vpop.f32.mrf.mxu3 }
 0x2fe   : > { %v1657_v48 = vmul.f32 %v1472_v11, %v1273_v57  ;;  %v1212_v17 = vsub.f32 %v1118_v13, %v1180_v63 }
 0x2ff   : > { %v1476_v20 = vmul.f32 0.5, %v1475_v47 }
 0x300   : > { %v1690_v34 = vmul.f32 %v3303_v21, %v1657_v48  ;;  %v1244_v22 = vmax.f32 %v1212_v17, 0.0  ;;  %v1276_v48 = vsub.f32 %v3273_v40, %v3513_v7 }
 0x301   : > { %v1477_v23 = vsub.f32 1.5, %v1476_v20 }
 0x302   : > { %v2324_v24 = vpop.eup %2323  ;;  %v1723_v26 = vadd.f32 %v3310_v32, %v1690_v34  ;;  %v1308_v62 = vadd.f32 1e-05, %v1244_v22 }
 0x303   : > { %v1478_v28 = vmul.f32 %v2322_v0, %v1477_v23  ;;  %v1484_v30 = vmul.f32 %v2324_v24, %v1307_v8  ;;  %v3522_v27 = vpop.f32.mrf.mxu2  ;;  %vm1490_vm0 = vweird.f32 %v2324_v24 }
 0x304   : > { %1755 = vst [vmem:[%s3326_s1 + $0x70] sm:$0xff] %v1723_v26  ;;  %2325 = vrsqrt.f32 %v1308_v62  ;;  %v1181_v19 = vmul.f32 %v3522_v27, %v3522_v27  ;;  %vm1491_vm2 = vmor %vm1489_vm1, %vm1490_vm0  ;;  %vm1499_vm4 = vweird.f32 %v1308_v62 }
 0x305   : > { %v1482_v6 = vsel %vm1481_vm15, %v2322_v0, %v1478_v28  ;;  %v1485_v52 = vmul.f32 %v2324_v24, %v1484_v30  ;;  %v1121_v36 = vpop.f32.mrf.mxu3 }
 0x306   : > { %v1658_v10 = vmul.f32 %v1482_v6, %v1274_v35  ;;  %v1213_v39 = vsub.f32 %v1121_v36, %v1181_v19  ;;  %v1277_v36 = vsub.f32 %v3283_v53, %v3522_v27 }
 0x307   : > { %v1486_v59 = vmul.f32 0.5, %v1485_v52 }
 0x308   : > { %v1691_v42 = vmul.f32 %v3303_v21, %v1658_v10  ;;  %v1245_v43 = vmax.f32 %v1213_v39, 0.0 }
 0x309   : > { %v1487_v49 = vsub.f32 1.5, %v1486_v59 }
 0x30a   : > { %v2326_v50 = vpop.eup %2325  ;;  %v1724_v31 = vadd.f32 %v3310_v32, %v1691_v42  ;;  %v1309_v18 = vadd.f32 1e-05, %v1245_v43 }
 0x30b   : > { %v1488_v51 = vmul.f32 %v2324_v24, %v1487_v49  ;;  %v1494_v54 = vmul.f32 %v2326_v50, %v1308_v62  ;;  %v3531_v55 = vpop.f32.mrf.mxu2  ;;  %vm1500_vm3 = vweird.f32 %v2326_v50 }
 0x30c   : > { %1756 = vst [vmem:[%s3326_s1 + $0x78] sm:$0xff] %v1724_v31  ;;  %2327 = vrsqrt.f32 %v1309_v18  ;;  %v1182_v58 = vmul.f32 %v3531_v55, %v3531_v55  ;;  %vm1501_vm5 = vmor %vm1499_vm4, %vm1500_vm3  ;;  %vm1509_vm7 = vweird.f32 %v1309_v18 }
 0x30d   : > { %v1492_v29 = vsel %vm1491_vm2, %v2324_v24, %v1488_v51  ;;  %v1495_v60 = vmul.f32 %v2326_v50, %v1494_v54  ;;  %v1124_v61 = vpop.f32.mrf.mxu3 }
 0x30e   : > { %v1659_v0 = vmul.f32 %v1492_v29, %v1275_v56  ;;  %v1214_v15 = vsub.f32 %v1124_v61, %v1182_v58 }
 0x30f   : > { %v1496_v14 = vmul.f32 0.5, %v1495_v60  ;;  %v1278_v60 = vsub.f32 %v3293_v5, %v3531_v55 }
 0x310   : > { %v1692_v8 = vmul.f32 %v3303_v21, %v1659_v0  ;;  %v1246_v4 = vmax.f32 %v1214_v15, 0.0 }
 0x311   : > { %v1497_v57 = vsub.f32 1.5, %v1496_v14 }
 0x312   : > { %v2328_v63 = vpop.eup %2327  ;;  %v1725_v33 = vadd.f32 %v3310_v32, %v1692_v8  ;;  %v1310_v25 = vadd.f32 1e-05, %v1246_v4 }
 0x313   : > { %v1498_v11 = vmul.f32 %v2326_v50, %v1497_v57  ;;  %v1504_v47 = vmul.f32 %v2328_v63, %v1309_v18  ;;  %v3540_v13 = vpop.f32.mrf.mxu2  ;;  %vm1510_vm6 = vweird.f32 %v2328_v63 }
 0x314   : > { %1757 = vst [vmem:[%s3326_s1 + $0x80] sm:$0xff] %v1725_v33  ;;  %2329 = vrsqrt.f32 %v1310_v25  ;;  %v1183_v17 = vmul.f32 %v3540_v13, %v3540_v13  ;;  %vm1511_vm8 = vmor %vm1509_vm7, %vm1510_vm6  ;;  %vm1519_vm10 = vweird.f32 %v1310_v25 }
 0x315   : > { %v1502_v20 = vsel %vm1501_vm5, %v2326_v50, %v1498_v11  ;;  %v1505_v34 = vmul.f32 %v2328_v63, %v1504_v47  ;;  %v1127_v22 = vpop.f32.mrf.mxu3 }
 0x316   : > { %v1660_v23 = vmul.f32 %v1502_v20, %v1276_v48  ;;  %v1215_v24 = vsub.f32 %v1127_v22, %v1183_v17  ;;  %v1279_v20 = vsub.f32 %v3314_v37, %v3540_v13 }
 0x317   : > { %v1506_v26 = vmul.f32 0.5, %v1505_v34 }
 0x318   : > { %v1693_v62 = vmul.f32 %v3303_v21, %v1660_v23  ;;  %v1247_v28 = vmax.f32 %v1215_v24, 0.0 }
 0x319   : > { %v1507_v30 = vsub.f32 1.5, %v1506_v26 }
 0x31a   : > { %v2330_v35 = vpop.eup %2329  ;;  %v1726_v40 = vadd.f32 %v3310_v32, %v1693_v62  ;;  %v1311_v7 = vadd.f32 1e-05, %v1247_v28 }
 0x31b   : > { %v1508_v19 = vmul.f32 %v2328_v63, %v1507_v30  ;;  %v1514_v6 = vmul.f32 %v2330_v35, %v1310_v25  ;;  %v3549_v52 = vpop.f32.mrf.mxu2  ;;  %vm1520_vm9 = vweird.f32 %v2330_v35 }
 0x31c   : > { %1758 = vst [vmem:[%s3326_s1 + $0x88] sm:$0xff] %v1726_v40  ;;  %2331 = vrsqrt.f32 %v1311_v7  ;;  %v1184_v10 = vmul.f32 %v3549_v52, %v3549_v52  ;;  %vm1521_vm11 = vmor %vm1519_vm10, %vm1520_vm9  ;;  %vm1529_vm13 = vweird.f32 %v1311_v7 }
 0x31d   : > { %v1512_v39 = vsel %vm1511_vm8, %v2328_v63, %v1508_v19  ;;  %v1515_v59 = vmul.f32 %v2330_v35, %v1514_v6  ;;  %v1130_v42 = vpop.f32.mrf.mxu3 }
 0x31e   : > { %v1661_v43 = vmul.f32 %v1512_v39, %v1277_v36  ;;  %v1216_v49 = vsub.f32 %v1130_v42, %v1184_v10  ;;  %v1280_v10 = vsub.f32 %v3335_v2, %v3549_v52 }
 0x31f   : > { %v1516_v50 = vmul.f32 0.5, %v1515_v59 }
 0x320   : > { %v1694_v31 = vmul.f32 %v3303_v21, %v1661_v43  ;;  %v1248_v18 = vmax.f32 %v1216_v49, 0.0 }
 0x321   : > { %v1517_v51 = vsub.f32 1.5, %v1516_v50 }
 0x322   : > { %v2332_v54 = vpop.eup %2331  ;;  %v1727_v53 = vadd.f32 %v3310_v32, %v1694_v31  ;;  %v1312_v27 = vadd.f32 1e-05, %v1248_v18 }
 0x323   : > { %v1518_v56 = vmul.f32 %v2330_v35, %v1517_v51  ;;  %v1524_v58 = vmul.f32 %v2332_v54, %v1311_v7  ;;  %v3558_v29 = vpop.f32.mrf.mxu2  ;;  %vm1530_vm12 = vweird.f32 %v2332_v54 }
 0x324   : > { %1759 = vst [vmem:[%s3326_s1 + $0x90] sm:$0xff] %v1727_v53  ;;  %2333 = vrsqrt.f32 %v1312_v27  ;;  %v1185_v61 = vmul.f32 %v3558_v29, %v3558_v29  ;;  %vm1531_vm14 = vmor %vm1529_vm13, %vm1530_vm12  ;;  %vm1539_vm0 = vweird.f32 %v1312_v27 }
 0x325   : > { %v1522_v0 = vsel %vm1521_vm11, %v2330_v35, %v1518_v56  ;;  %v1525_v15 = vmul.f32 %v2332_v54, %v1524_v58  ;;  %v1133_v14 = vpop.f32.mrf.mxu3 }
 0x326   : > { %v1662_v8 = vmul.f32 %v1522_v0, %v1278_v60  ;;  %v1217_v4 = vsub.f32 %v1133_v14, %v1185_v61  ;;  %v1281_v60 = vsub.f32 %v3352_v16, %v3558_v29 }
 0x327   : > { %v1526_v57 = vmul.f32 0.5, %v1525_v15 }
 0x328   : > { %v1695_v63 = vmul.f32 %v3303_v21, %v1662_v8  ;;  %v1249_v33 = vmax.f32 %v1217_v4, 0.0 }
 0x329   : > { %v1527_v25 = vsub.f32 1.5, %v1526_v57 }
 0x32a   : > { %v2334_v11 = vpop.eup %2333  ;;  %v1728_v5 = vadd.f32 %v3310_v32, %v1695_v63  ;;  %v1313_v55 = vadd.f32 1e-05, %v1249_v33 }
 0x32b   : > { %v1528_v47 = vmul.f32 %v2332_v54, %v1527_v25  ;;  %v1534_v48 = vmul.f32 %v2334_v11, %v1312_v27  ;;  %v3567_v17 = vpop.f32.mrf.mxu2  ;;  %vm1540_vm15 = vweird.f32 %v2334_v11 }
 0x32c   : > { %1760 = vst [vmem:[%s3326_s1 + $0x98] sm:$0xff] %v1728_v5  ;;  %2335 = vrsqrt.f32 %v1313_v55  ;;  %v1186_v34 = vmul.f32 %v3567_v17, %v3567_v17  ;;  %vm1541_vm1 = vmor %vm1539_vm0, %vm1540_vm15  ;;  %vm1549_vm3 = vweird.f32 %v1313_v55 }
 0x32d   : > { %v1532_v22 = vsel %vm1531_vm14, %v2332_v54, %v1528_v47  ;;  %v1535_v23 = vmul.f32 %v2334_v11, %v1534_v48  ;;  %v1136_v24 = vpop.f32.mrf.mxu3  ;;  %v1282_v48 = vsub.f32 %v3368_v3, %v3567_v17 }
 0x32e   : > { %v1663_v26 = vmul.f32 %v1532_v22, %v1279_v20  ;;  %v1218_v62 = vsub.f32 %v1136_v24, %v1186_v34 }
 0x32f   : > { %v1536_v28 = vmul.f32 0.5, %v1535_v23 }
 0x330   : > { %v1696_v30 = vmul.f32 %v3303_v21, %v1663_v26  ;;  %v1250_v35 = vmax.f32 %v1218_v62, 0.0 }
 0x331   : > { %v1537_v40 = vsub.f32 1.5, %v1536_v28 }
 0x332   : > { %v2336_v7 = vpop.eup %2335  ;;  %v1729_v37 = vadd.f32 %v3310_v32, %v1696_v30  ;;  %v1314_v13 = vadd.f32 1e-05, %v1250_v35 }
 0x333   : > { %v1538_v19 = vmul.f32 %v2334_v11, %v1537_v40  ;;  %v1544_v6 = vmul.f32 %v2336_v7, %v1313_v55  ;;  %v3576_v36 = vpop.f32.mrf.mxu2  ;;  %vm1550_vm2 = vweird.f32 %v2336_v7 }
 0x334   : > { %1761 = vst [vmem:[%s3326_s1 + $0xa0] sm:$0xff] %v1729_v37  ;;  %2337 = vrsqrt.f32 %v1314_v13  ;;  %v1187_v39 = vmul.f32 %v3576_v36, %v3576_v36  ;;  %vm1551_vm4 = vmor %vm1549_vm3, %vm1550_vm2  ;;  %vm1559_vm6 = vweird.f32 %v1314_v13 }
 0x335   : > { %v1542_v59 = vsel %vm1541_vm1, %v2334_v11, %v1538_v19  ;;  %v1545_v42 = vmul.f32 %v2336_v7, %v1544_v6  ;;  %v1139_v43 = vpop.f32.mrf.mxu3  ;;  %v1283_v19 = vsub.f32 %v3383_v38, %v3576_v36 }
 0x336   : > { %v1664_v49 = vmul.f32 %v1542_v59, %v1280_v10  ;;  %v1219_v50 = vsub.f32 %v1139_v43, %v1187_v39 }
 0x337   : > { %v1546_v31 = vmul.f32 0.5, %v1545_v42 }
 0x338   : > { %v1697_v18 = vmul.f32 %v3303_v21, %v1664_v49  ;;  %v1251_v51 = vmax.f32 %v1219_v50, 0.0 }
 0x339   : > { %v1547_v54 = vsub.f32 1.5, %v1546_v31 }
 0x33a   : > { %v2338_v53 = vpop.eup %2337  ;;  %v1730_v2 = vadd.f32 %v3310_v32, %v1697_v18  ;;  %v1315_v52 = vadd.f32 1e-05, %v1251_v51 }
 0x33b   : > { %v1548_v27 = vmul.f32 %v2336_v7, %v1547_v54  ;;  %v1554_v56 = vmul.f32 %v2338_v53, %v1314_v13  ;;  %v3585_v58 = vpop.f32.mrf.mxu2  ;;  %vm1560_vm5 = vweird.f32 %v2338_v53 }
 0x33c   : > { %1762 = vst [vmem:[%s3326_s1 + $0xa8] sm:$0xff] %v1730_v2  ;;  %2339 = vrsqrt.f32 %v1315_v52  ;;  %v1188_v61 = vmul.f32 %v3585_v58, %v3585_v58  ;;  %vm1561_vm7 = vmor %vm1559_vm6, %vm1560_vm5  ;;  %vm1569_vm9 = vweird.f32 %v1315_v52 }
 0x33d   : > { %v1552_v0 = vsel %vm1551_vm4, %v2336_v7, %v1548_v27  ;;  %v1555_v15 = vmul.f32 %v2338_v53, %v1554_v56  ;;  %v1142_v14 = vpop.f32.mrf.mxu3 }
 0x33e   : > { %v1665_v8 = vmul.f32 %v1552_v0, %v1281_v60  ;;  %v1220_v4 = vsub.f32 %v1142_v14, %v1188_v61 }
 0x33f   : > { %v1556_v57 = vmul.f32 0.5, %v1555_v15 }
 0x340   : > { %v1698_v63 = vmul.f32 %v3303_v21, %v1665_v8  ;;  %v1252_v33 = vmax.f32 %v1220_v4, 0.0 }
 0x341   : > { %v1557_v25 = vsub.f32 1.5, %v1556_v57 }
 0x342   : > { %v2340_v11 = vpop.eup %2339  ;;  %v1731_v16 = vadd.f32 %v3310_v32, %v1698_v63  ;;  %v1316_v29 = vadd.f32 1e-05, %v1252_v33 }
 0x343   : > { %v1558_v5 = vmul.f32 %v2338_v53, %v1557_v25  ;;  %v1564_v55 = vmul.f32 %v2340_v11, %v1315_v52  ;;  %v3594_v47 = vpop.f32.mrf.mxu2  ;;  %vm1570_vm8 = vweird.f32 %v2340_v11  ;;  %v1284_v52 = vsub.f32 %v3398_v45, %v3585_v58 }
 0x344   : > { %1763 = vst [vmem:[%s3326_s1 + $0xb0] sm:$0xff] %v1731_v16  ;;  %2341 = vrsqrt.f32 %v1316_v29  ;;  %v1189_v20 = vmul.f32 %v3594_v47, %v3594_v47  ;;  %vm1571_vm10 = vmor %vm1569_vm9, %vm1570_vm8  ;;  %vm1579_vm12 = vweird.f32 %v1316_v29  ;;  %v1285_v16 = vsub.f32 %v3413_v12, %v3594_v47 }
 0x345   : > { %v1562_v34 = vsel %vm1561_vm7, %v2338_v53, %v1558_v5  ;;  %v1565_v22 = vmul.f32 %v2340_v11, %v1564_v55  ;;  %v1145_v23 = vpop.f32.mrf.mxu3 }
 0x346   : > { %v1666_v24 = vmul.f32 %v1562_v34, %v1282_v48  ;;  %v1221_v26 = vsub.f32 %v1145_v23, %v1189_v20 }
 0x347   : > { %v1566_v62 = vmul.f32 0.5, %v1565_v22 }
 0x348   : > { %v1699_v28 = vmul.f32 %v3303_v21, %v1666_v24  ;;  %v1253_v30 = vmax.f32 %v1221_v26, 0.0 }
 0x349   : > { %v1567_v35 = vsub.f32 1.5, %v1566_v62 }
 0x34a   : > { %v2342_v40 = vpop.eup %2341  ;;  %v1732_v3 = vadd.f32 %v3310_v32, %v1699_v28  ;;  %v1317_v17 = vadd.f32 1e-05, %v1253_v30 }
 0x34b   : > { %v1568_v7 = vmul.f32 %v2340_v11, %v1567_v35  ;;  %v1574_v37 = vmul.f32 %v2342_v40, %v1316_v29  ;;  %v3603_v13 = vpop.f32.mrf.mxu2  ;;  %vm1580_vm11 = vweird.f32 %v2342_v40 }
 0x34c   : > { %1764 = vst [vmem:[%s3326_s1 + $0xb8] sm:$0xff] %v1732_v3  ;;  %2343 = vrsqrt.f32 %v1317_v17  ;;  %v1190_v6 = vmul.f32 %v3603_v13, %v3603_v13  ;;  %vm1581_vm13 = vmor %vm1579_vm12, %vm1580_vm11  ;;  %vm1589_vm15 = vweird.f32 %v1317_v17 }
 0x34d   : > { %v1572_v10 = vsel %vm1571_vm10, %v2340_v11, %v1568_v7  ;;  %v1575_v39 = vmul.f32 %v2342_v40, %v1574_v37  ;;  %v1148_v59 = vpop.f32.mrf.mxu3 }
 0x34e   : > { %v1667_v42 = vmul.f32 %v1572_v10, %v1283_v19  ;;  %v1222_v43 = vsub.f32 %v1148_v59, %v1190_v6 }
 0x34f   : > { %v1576_v49 = vmul.f32 0.5, %v1575_v39 }
 0x350   : > { %v1700_v50 = vmul.f32 %v3303_v21, %v1667_v42  ;;  %v1254_v31 = vmax.f32 %v1222_v43, 0.0 }
 0x351   : > { %v1577_v18 = vsub.f32 1.5, %v1576_v49 }
 0x352   : > { %v2344_v51 = vpop.eup %2343  ;;  %v1733_v38 = vadd.f32 %v3310_v32, %v1700_v50  ;;  %v1318_v36 = vadd.f32 1e-05, %v1254_v31 }
 0x353   : > { %v1578_v54 = vmul.f32 %v2342_v40, %v1577_v18  ;;  %v1584_v53 = vmul.f32 %v2344_v51, %v1317_v17  ;;  %v3612_v2 = vpop.f32.mrf.mxu2  ;;  %vm1590_vm14 = vweird.f32 %v2344_v51 }
 0x354   : > { %1765 = vst [vmem:[%s3326_s1 + $0xc0] sm:$0xff] %v1733_v38  ;;  %2345 = vrsqrt.f32 %v1318_v36  ;;  %v1191_v27 = vmul.f32 %v3612_v2, %v3612_v2  ;;  %vm1591_vm0 = vmor %vm1589_vm15, %vm1590_vm14  ;;  %vm1599_vm2 = vweird.f32 %v1318_v36  ;;  %v1287_v18 = vsub.f32 %v3443_v9, %v3612_v2 }
 0x355   : > { %v1582_v56 = vsel %vm1581_vm13, %v2342_v40, %v1578_v54  ;;  %v1585_v60 = vmul.f32 %v2344_v51, %v1584_v53  ;;  %v1151_v61 = vpop.f32.mrf.mxu3  ;;  %v1286_v40 = vsub.f32 %v3428_v44, %v3603_v13 }
 0x356   : > { %v1668_v0 = vmul.f32 %v1582_v56, %v1284_v52  ;;  %v1223_v15 = vsub.f32 %v1151_v61, %v1191_v27 }
 0x357   : > { %v1586_v14 = vmul.f32 0.5, %v1585_v60 }
 0x358   : > { %v1701_v8 = vmul.f32 %v3303_v21, %v1668_v0  ;;  %v1255_v4 = vmax.f32 %v1223_v15, 0.0 }
 0x359   : > { %v1587_v57 = vsub.f32 1.5, %v1586_v14 }
 0x35a   : > { %v2346_v63 = vpop.eup %2345  ;;  %v1734_v45 = vadd.f32 %v3310_v32, %v1701_v8  ;;  %v1319_v58 = vadd.f32 1e-05, %v1255_v4 }
 0x35b   : > { %v1588_v33 = vmul.f32 %v2344_v51, %v1587_v57  ;;  %v1594_v25 = vmul.f32 %v2346_v63, %v1318_v36  ;;  %v3621_v11 = vpop.f32.mrf.mxu2  ;;  %vm1600_vm1 = vweird.f32 %v2346_v63 }
 0x35c   : > { %1766 = vst [vmem:[%s3326_s1 + $0xc8] sm:$0xff] %v1734_v45  ;;  %2347 = vrsqrt.f32 %v1319_v58  ;;  %v1192_v29 = vmul.f32 %v3621_v11, %v3621_v11  ;;  %vm1601_vm3 = vmor %vm1599_vm2, %vm1600_vm1  ;;  %vm1609_vm5 = vweird.f32 %v1319_v58  ;;  %v1288_v8 = vsub.f32 %v3458_v41, %v3621_v11 }
 0x35d   : > { %v1592_v5 = vsel %vm1591_vm0, %v2344_v51, %v1588_v33  ;;  %v1595_v55 = vmul.f32 %v2346_v63, %v1594_v25  ;;  %v1154_v48 = vpop.f32.mrf.mxu3 }
 0x35e   : > { %v1669_v20 = vmul.f32 %v1592_v5, %v1285_v16  ;;  %v1224_v34 = vsub.f32 %v1154_v48, %v1192_v29 }
 0x35f   : > { %v1596_v22 = vmul.f32 0.5, %v1595_v55 }
 0x360   : > { %v1702_v23 = vmul.f32 %v3303_v21, %v1669_v20  ;;  %v1256_v24 = vmax.f32 %v1224_v34, 0.0 }
 0x361   : > { %v1597_v26 = vsub.f32 1.5, %v1596_v22 }
 0x362   : > { %v2348_v62 = vpop.eup %2347  ;;  %v1735_v12 = vadd.f32 %v3310_v32, %v1702_v23  ;;  %v1320_v47 = vadd.f32 1e-05, %v1256_v24 }
 0x363   : > { %v1598_v28 = vmul.f32 %v2346_v63, %v1597_v26  ;;  %v1604_v30 = vmul.f32 %v2348_v62, %v1319_v58  ;;  %v3630_v35 = vpop.f32.mrf.mxu2  ;;  %vm1610_vm4 = vweird.f32 %v2348_v62 }
 0x364   : > { %1767 = vst [vmem:[%s3326_s1 + $0xd0] sm:$0xff] %v1735_v12  ;;  %2349 = vrsqrt.f32 %v1320_v47  ;;  %v1193_v3 = vmul.f32 %v3630_v35, %v3630_v35  ;;  %vm1611_vm6 = vmor %vm1609_vm5, %vm1610_vm4  ;;  %vm1619_vm8 = vweird.f32 %v1320_v47  ;;  %v1289_v41 = vsub.f32 %v3473_v46, %v3630_v35 }
 0x365   : > { %v1602_v17 = vsel %vm1601_vm3, %v2346_v63, %v1598_v28  ;;  %v1605_v7 = vmul.f32 %v2348_v62, %v1604_v30  ;;  %v1157_v37 = vpop.f32.mrf.mxu3 }
 0x366   : > { %v1670_v19 = vmul.f32 %v1602_v17, %v1286_v40  ;;  %v1225_v6 = vsub.f32 %v1157_v37, %v1193_v3 }
 0x367   : > { %v1606_v10 = vmul.f32 0.5, %v1605_v7 }
 0x368   : > { %v1703_v39 = vmul.f32 %v3303_v21, %v1670_v19  ;;  %v1257_v59 = vmax.f32 %v1225_v6, 0.0 }
 0x369   : > { %v1607_v42 = vsub.f32 1.5, %v1606_v10 }
 0x36a   : > { %v2350_v43 = vpop.eup %2349  ;;  %v1736_v44 = vadd.f32 %v3310_v32, %v1703_v39  ;;  %v1321_v13 = vadd.f32 1e-05, %v1257_v59 }
 0x36b   : > { %v1608_v49 = vmul.f32 %v2348_v62, %v1607_v42  ;;  %v1614_v50 = vmul.f32 %v2350_v43, %v1320_v47  ;;  %v1015_v31 = vpop.f32.mrf.mxu2  ;;  %vm1620_vm7 = vweird.f32 %v2350_v43 }
 0x36c   : > { %1768 = vst [vmem:[%s3326_s1 + $0xd8] sm:$0xff] %v1736_v44  ;;  %2351 = vrsqrt.f32 %v1321_v13  ;;  %v1194_v51 = vmul.f32 %v1015_v31, %v1015_v31  ;;  %vm1621_vm9 = vmor %vm1619_vm8, %vm1620_vm7  ;;  %vm1629_vm11 = vweird.f32 %v1321_v13  ;;  %v1290_v46 = vsub.f32 %v3488_v1, %v1015_v31 }
 0x36d   : > { %v1612_v38 = vsel %vm1611_vm6, %v2348_v62, %v1608_v49  ;;  %v1615_v36 = vmul.f32 %v2350_v43, %v1614_v50  ;;  %v1160_v54 = vpop.f32.mrf.mxu3 }
 0x36e   : > { %v1671_v53 = vmul.f32 %v1612_v38, %v1287_v18  ;;  %v1226_v52 = vsub.f32 %v1160_v54, %v1194_v51 }
 0x36f   : > { %v1616_v27 = vmul.f32 0.5, %v1615_v36 }
 0x370   : > { %v1704_v56 = vmul.f32 %v3303_v21, %v1671_v53  ;;  %v1258_v60 = vmax.f32 %v1226_v52, 0.0 }
 0x371   : > { %v1617_v61 = vsub.f32 1.5, %v1616_v27 }
 0x372   : > { %v2352_v0 = vpop.eup %2351  ;;  %v1737_v15 = vadd.f32 %v3310_v32, %v1704_v56  ;;  %v1322_v14 = vadd.f32 1e-05, %v1258_v60 }
 0x373   : > { %v1618_v9 = vmul.f32 %v2350_v43, %v1617_v61  ;;  %v1624_v2 = vmul.f32 %v2352_v0, %v1321_v13  ;;  %vm1630_vm10 = vweird.f32 %v2352_v0 }
 0x374   : > { %1769 = vst [vmem:[%s3326_s1 + $0xe0] sm:$0xff] %v1737_v15  ;;  %2353 = vrsqrt.f32 %v1322_v14  ;;  %vm1631_vm12 = vmor %vm1629_vm11, %vm1630_vm10  ;;  %vm1639_vm14 = vweird.f32 %v1322_v14 }
 0x375   : > { %v1622_v4 = vsel %vm1621_vm9, %v2350_v43, %v1618_v9  ;;  %v1625_v57 = vmul.f32 %v2352_v0, %v1624_v2 }
 0x376   : > { %v1672_v63 = vmul.f32 %v1622_v4, %v1288_v8 }
 0x377   : > { %v1626_v45 = vmul.f32 0.5, %v1625_v57 }
 0x378   : > { %v1705_v58 = vmul.f32 %v3303_v21, %v1672_v63 }
 0x379   : > { %v1627_v33 = vsub.f32 1.5, %v1626_v45 }
 0x37a   : > { %v2354_v25 = vpop.eup %2353  ;;  %v1738_v16 = vadd.f32 %v3310_v32, %v1705_v58 }
 0x37b   : > { %v1628_v29 = vmul.f32 %v2352_v0, %v1627_v33  ;;  %v1634_v5 = vmul.f32 %v2354_v25, %v1322_v14  ;;  %vm1640_vm13 = vweird.f32 %v2354_v25 }
 0x37c   : > { %1770 = vst [vmem:[%s3326_s1 + $0xe8] sm:$0xff] %v1738_v16  ;;  %vm1641_vm15 = vmor %vm1639_vm14, %vm1640_vm13 }
 0x37d   : > { %v1632_v11 = vsel %vm1631_vm12, %v2352_v0, %v1628_v29  ;;  %v1635_v55 = vmul.f32 %v2354_v25, %v1634_v5 }
 0x37e   : > { %v1673_v48 = vmul.f32 %v1632_v11, %v1289_v41 }
 0x37f   : > { %v1636_v20 = vmul.f32 0.5, %v1635_v55 }
 0x380   : > { %v1706_v34 = vmul.f32 %v3303_v21, %v1673_v48 }
 0x381   : > { %v1637_v22 = vsub.f32 1.5, %v1636_v20 }
 0x382   : > { %v1739_v23 = vadd.f32 %v3310_v32, %v1706_v34 }
 0x383   : > { %v1638_v24 = vmul.f32 %v2354_v25, %v1637_v22 }
 0x384   : > { %1771 = vst [vmem:[%s3326_s1 + $0xf0] sm:$0xff] %v1739_v23 }
 0x385   : > { %v1642_v26 = vsel %vm1641_vm15, %v2354_v25, %v1638_v24 }
 0x386   : > { %v1674_v62 = vmul.f32 %v1642_v26, %v1290_v46 }
 0x388   : > { %v1707_v12 = vmul.f32 %v3303_v21, %v1674_v62 }
 0x38a   : > { %v1740_v47 = vadd.f32 %v3310_v32, %v1707_v12 }
 0x38c   : > { %1772 = vst [vmem:[%s3326_s1 + $0xf8] sm:$0xff] %v1740_v47 }
 0x38d   : > { %2544 = shalt.err (!%p2541_p7)
}
 0x38e   : > { %s2681_s0 = smov 128   ;;  %s2682_s6 = smov 8  }
 0x38f   : > { %2146 = dma.vmem_to_hbm [thread:$0]  (%p3815_p10), %s1787_s16, 4096, %s1789_s17, %s1774_s21, %s2681_s0, %s2681_s0, %s2682_s6  }
 0x390 PF: > { %s3816_s2 = sld [smem:[#allocation30_spill]]  ;;  %p2178_p4 = scmp.ge.s32.totalorder %s2673_s12, 2 }
 0x391   : > { %s3817_s11 = sld [smem:[#allocation37_spill]] }
 0x396   : > { %s1803_s20 = sand.u32 1, %s3816_s2  }
 0x397   : > { %p3818_p8 = scmp.ne.s32.totalorder %s3817_s11, 0  ;;  %s1804_s5 = scalar_lea.sflag [#allocation6], %s1803_s20 }
 0x399   : > { %p2172_p13 = pnand %p2178_p4, %p3818_p8 }
 0x39b   : > { %p2173_p3 = pneg %p2172_p13 }
 0x39d   : > { %2620 = dma.done.wait (%p2173_p3), %s1804_s5, 4096  }
 0x39e   : > { %2622 = vsyncadd (%p2173_p3), %s1804_s5, 4294963200  ;;  %s3819_s12 = sld [smem:[#allocation32_spill]]  ;;  %s3828_s25 = smov %s2629_s26 }
 0x39f   : > { %s3820_s1 = sld [smem:[#allocation27_spill]]  ;;  %s3829_s26 = smov %s2633_s27 }
 0x3a0   : > { %s3821_s29 = sld [smem:[#allocation38_spill]]  ;;  %s3830_s27 = smov %s3034_s23 }
 0x3a1   : > { %s3822_s30 = sld [smem:[#allocation28_spill]]  ;;  %s3831_s0 = smov %s2641_s28 }
 0x3a2   : > { %s3823_s7 = sld [smem:[#allocation29_spill]]  ;;  %s3833_s9 = smov %s2665_s10 }
 0x3a3   : > { %s3824_s8 = sld [smem:[#allocation34_spill]] }
 0x3a4   : > { %s3825_s22 = sld [smem:[#allocation31_spill]]  ;;  %p33_p11 = scmp.ge.s32.totalorder %s3819_s12, 5  }
 0x3a5   : > { %s3826_s11 = sld [smem:[#allocation35_spill]]  ;;  %s3832_s28 = smov %s3820_s1 }
 0x3a6   :  { %35 = sbr.rel (!%p33_p11) target bundleno = 23 (0x17), region = 126 }
 0x3aa   : > { %s3834_s10 = smov %s3825_s22 }
 0x3ab   :  { %1810 = vsyncpa [#allocation5], 1 }
 0x3ac   :  { %1812 = vsyncpa [#allocation5 + $0x1], 1 }
 0x3ad   :  { %1813 = vsyncpa [#allocation8], 1 }
 0x3ae   :  { %1815 = vsyncpa [#allocation8 + $0x1], 1 }
 0x3af   :  { %1816 = vsyncpa [#allocation11], 1 }
 0x3b0   :  { %1818 = vsyncpa [#allocation11 + $0x1], 1 }
 0x3b1   :  { %1819 = vsyncpa [#allocation6], 1 }
 0x3b2   :  { %1821 = vsyncpa [#allocation6 + $0x1], 1 }

</bundles_post_ra>
